<compile_context>
chip_gen: v6e
topology: v6e:2x2x1
jax: 0.10.0
libtpu: 0.0.40
codegen_flags: <defaults>
</compile_context>

<pallas_src>
import functools

import jax
import jax.numpy as jnp
from jax.experimental import pallas as pl
from jax.experimental.pallas import tpu as pltpu

NEG_INF = -1e30  # sentinel for masked-out scores (exp underflows to 0)


def _layer_norm(x, gamma, beta, eps=1e-5):
    mean = jnp.mean(x, axis=-1, keepdims=True)
    var = jnp.mean((x - mean) ** 2, axis=-1, keepdims=True)
    return (x - mean) * jax.lax.rsqrt(var + eps) * gamma + beta


def gat_kernel(src_ref, tgt_ref, wq_ref, wkv_ref, w1_ref, w2_ref, vec_ref,
               out_ref, attn_ref, *, batch, n_src, n_tgt, hidden_dim,
               num_heads, topk):
    H = hidden_dim
    chunk = num_heads                      # torch.split(x, num_heads, dim=-1)
    n_chunks = H // chunk

    # packed parameter vectors: bq, bk, bv, b1, b2, g1, be1, g2, be2
    vec = vec_ref[...]
    bq, bk, bv = vec[0:1, :], vec[1:2, :], vec[2:3, :]
    b1, b2 = vec[3:4, :], vec[4:5, :]
    g1, be1 = vec[5:6, :], vec[6:7, :]
    g2, be2 = vec[7:8, :], vec[8:9, :]

    tgt2 = tgt_ref[...]                    # (B*N_tgt, H), native dtype -> MXU
    src2 = src_ref[...]                    # (B*N_src, H)

    scale = 1.0 / (H ** 0.5)

    # fused projections: Q from tgt, K|V fused from src (2 MXU dots, not 3)
    q2 = (jnp.dot(tgt2, wq_ref[...], preferred_element_type=jnp.float32)
          + bq) * scale
    kv = jnp.dot(src2, wkv_ref[...], preferred_element_type=jnp.float32)
    k2 = kv[:, :H] + bk
    v2 = kv[:, H:] + bv

    # leading-dim splits only (layout preserving)
    q3 = q2.reshape(batch, n_tgt, H)
    k3 = k2.reshape(batch, n_src, H)
    v3 = v2.reshape(batch, n_src, H)

    # per-chunk sparse (top-k) attention, batched over the batch dimension
    for c in range(n_chunks):
        lo = c * chunk
        qc = q3[:, :, lo:lo + chunk]       # (B, N_tgt, chunk)
        kc = k3[:, :, lo:lo + chunk]       # (B, N_src, chunk)
        vc = v3[:, :, lo:lo + chunk]       # (B, N_src, chunk)

        # scores: (B, N_tgt, N_src)
        s = jnp.einsum('bnd,bmd->bnm', qc, kc,
                       preferred_element_type=jnp.float32)

        # top-k threshold via iterated max; the first max doubles as the
        # softmax row max.  NOTE: with tied scores the retained set can differ
        # from torch.topk (fine for continuous random inputs); requires
        # topk < N_src, otherwise the mask degenerates to all-ones.
        cur = s
        row_max = None
        thr = None
        for t in range(topk):
            thr = jnp.max(cur, axis=-1, keepdims=True)
            if t == 0:
                row_max = thr
            cur = jnp.where(cur >= thr, NEG_INF, cur)

        # masked softmax: non-topk entries get probability 0; divide on EUP
        e = jnp.where(s >= thr, jnp.exp(s - row_max), 0.0)
        denom = jnp.sum(e, axis=-1, keepdims=True)     # >= 1 (max term is 1)
        p = e * pl.reciprocal(denom, approx=True)

        # weighted sum of V, written straight into the scratch accumulator
        attn_ref[:, :, lo:lo + chunk] = jnp.einsum(
            'bnm,bmd->bnd', p, vc, preferred_element_type=jnp.float32)

    attn2 = attn_ref[...].reshape(batch * n_tgt, H)    # leading-dim merge

    # residual + norm1
    x1 = _layer_norm(tgt2.astype(jnp.float32) + attn2, g1, be1)

    # feed-forward (dropout == identity in eval mode)
    h = jnp.maximum(
        jnp.dot(x1, w1_ref[...], preferred_element_type=jnp.float32) + b1, 0.0)
    ff = jnp.dot(h, w2_ref[...], preferred_element_type=jnp.float32) + b2

    # residual + norm2
    out_ref[...] = _layer_norm(x1 + ff, g2, be2).astype(out_ref.dtype)


def graph_attention_layer(src, tgt, params, *, num_heads, topk):
    B, N_src, H = src.shape
    _, N_tgt, _ = tgt.shape

    # wrapper-side (free) packing / reshapes
    src2 = src.reshape(B * N_src, H)
    tgt2 = tgt.reshape(B * N_tgt, H)
    wq = params["wq"].T                                              # (H, H)
    wkv = jnp.concatenate([params["wk"].T, params["wv"].T], axis=1)  # (H, 2H)
    w1 = params["w1"].T
    w2 = params["w2"].T
    vec = jnp.stack([params["bq"], params["bk"], params["bv"],
                     params["b1"], params["b2"],
                     params["g1"], params["be1"],
                     params["g2"], params["be2"]], axis=0)           # (9, H)

    def full(shape):
        return pl.BlockSpec(shape, lambda i: (0,) * len(shape))

    kernel = functools.partial(
        gat_kernel, batch=B, n_src=N_src, n_tgt=N_tgt,
        hidden_dim=H, num_heads=num_heads, topk=topk)

    out2 = pl.pallas_call(
        kernel,
        out_shape=jax.ShapeDtypeStruct((B * N_tgt, H), tgt.dtype),
        grid_spec=pltpu.PrefetchScalarGridSpec(
            num_scalar_prefetch=0,
            grid=(1,),
            in_specs=[full((B * N_src, H)), full((B * N_tgt, H)),
                      full((H, H)), full((H, 2 * H)),
                      full((H, H)), full((H, H)),
                      full((9, H))],
            out_specs=full((B * N_tgt, H)),
            scratch_shapes=[pltpu.VMEM((B, N_tgt, H), jnp.float32)],
        ),
        compiler_params=pltpu.CompilerParams(
            dimension_semantics=("arbitrary",),
            vmem_limit_bytes=32 * 1024 * 1024),
    )(src2, tgt2, wq, wkv, w1, w2, vec)

    return out2.reshape(B, N_tgt, H)


# ----------------------- pure-JAX reference (for checking) ------------------
def reference(src, tgt, p, *, num_heads, topk):
    B, _, H = src.shape
    chunk = num_heads
    n_chunks = H // chunk
    lin = lambda x, w, b: x @ w.T + b
    q = lin(tgt, p["wq"], p["bq"])
    k = lin(src, p["wk"], p["bk"])
    v = lin(src, p["wv"], p["bv"])

    def split_cat0(x):  # (B,N,H) -> (n_chunks*B, N, chunk)
        return jnp.concatenate(
            [x[:, :, c * chunk:(c + 1) * chunk] for c in range(n_chunks)], axis=0)

    qs = split_cat0(q) / H ** 0.5
    ks = split_cat0(k)
    vs = split_cat0(v)
    s = jnp.einsum("btd,bsd->bts", qs, ks)
    kth = jnp.sort(s, axis=-1)[..., -topk]
    masked = jnp.where(s >= kth[..., None], s, -jnp.inf)
    prob = jax.nn.softmax(masked, axis=-1)
    o = jnp.einsum("bts,bsd->btd", prob, vs)
    o = jnp.concatenate([o[c * B:(c + 1) * B] for c in range(n_chunks)], axis=-1)

    def ln(x, g, be):
        mean = x.mean(-1, keepdims=True)
        var = ((x - mean) ** 2).mean(-1, keepdims=True)
        return (x - mean) / jnp.sqrt(var + 1e-5) * g + be

    x1 = ln(tgt + o, p["g1"], p["be1"])
    h = jax.nn.relu(lin(x1, p["w1"], p["b1"]))
    ff = lin(h, p["w2"], p["b2"])
    return ln(x1 + ff, p["g2"], p["be2"])


# ------------------------------------ main -----------------------------------
if __name__ == "__main__":
    # small shapes consistent with the module
    B, N, H = 2, 8, 32          # batch, num_nodes, hidden_dim
    NUM_HEADS = 4               # chunk size of torch.split(..., num_heads, -1)
    TOPK = 3

    key = jax.random.PRNGKey(0)
    ks = jax.random.split(key, 12)

    def linear_init(kw, kb, fan_in):
        bound = 1.0 / (fan_in ** 0.5)
        w = jax.random.uniform(kw, (H, H), jnp.float32, -bound, bound)
        b = jax.random.uniform(kb, (H,), jnp.float32, -bound, bound)
        return w, b

    params = {}
    params["wq"], params["bq"] = linear_init(ks[0], ks[1], H)
    params["wk"], params["bk"] = linear_init(ks[2], ks[3], H)
    params["wv"], params["bv"] = linear_init(ks[4], ks[5], H)
    params["w1"], params["b1"] = linear_init(ks[6], ks[7], H)
    params["w2"], params["b2"] = linear_init(ks[8], ks[9], H)
    params["g1"] = jnp.ones((H,), jnp.float32)
    params["be1"] = jnp.zeros((H,), jnp.float32)
    params["g2"] = jnp.ones((H,), jnp.float32)
    params["be2"] = jnp.zeros((H,), jnp.float32)

    src = jax.random.normal(ks[10], (B, N, H), jnp.float32)
    tgt = jax.random.normal(ks[11], (B, N, H), jnp.float32)

    out = graph_attention_layer(src, tgt, params, num_heads=NUM_HEADS, topk=TOPK)
    out = jax.block_until_ready(out)

    ref = reference(src, tgt, params, num_heads=NUM_HEADS, topk=TOPK)
    assert out.shape == (B, N, H)
    # tolerance accounts for pl.reciprocal(approx=True) in the softmax denom
    assert jnp.allclose(out, ref, atol=5e-3, rtol=5e-3), "mismatch vs JAX reference"

    # TODO(synk): train-mode nn.Dropout (stochastic masking) is not reproduced;
    # forward is implemented in eval mode (dropout == identity).
    print("KERNEL_OK")
</pallas_src>

<mosaic_0001>
module attributes {stable_mosaic.version = 11 : i64} {
  func.func @gat_kernel(%arg0: i32, %arg1: memref<16x32xf32, #tpu.memory_space<vmem>>, %arg2: memref<16x32xf32, #tpu.memory_space<vmem>>, %arg3: memref<32x32xf32, #tpu.memory_space<vmem>>, %arg4: memref<32x64xf32, #tpu.memory_space<vmem>>, %arg5: memref<32x32xf32, #tpu.memory_space<vmem>>, %arg6: memref<32x32xf32, #tpu.memory_space<vmem>>, %arg7: memref<9x32xf32, #tpu.memory_space<vmem>>, %arg8: memref<16x32xf32, #tpu.memory_space<vmem>>, %arg9: memref<2x8x32xf32, #tpu.memory_space<vmem>>) attributes {dimension_semantics = [#tpu.dimension_semantics<arbitrary>], iteration_bounds = array<i64: 1>, scalar_prefetch = 0 : i64, scratch_operands = 1 : i64, tpu.core_type = #tpu.core_type<tc>, window_params = [{pipeline_mode = #tpu.pipeline_mode<synchronous>, transform_indices = @transform_0, window_bounds = array<i64: 16, 32>}, {pipeline_mode = #tpu.pipeline_mode<synchronous>, transform_indices = @transform_1, window_bounds = array<i64: 16, 32>}, {pipeline_mode = #tpu.pipeline_mode<synchronous>, transform_indices = @transform_2, window_bounds = array<i64: 32, 32>}, {pipeline_mode = #tpu.pipeline_mode<synchronous>, transform_indices = @transform_3, window_bounds = array<i64: 32, 64>}, {pipeline_mode = #tpu.pipeline_mode<synchronous>, transform_indices = @transform_4, window_bounds = array<i64: 32, 32>}, {pipeline_mode = #tpu.pipeline_mode<synchronous>, transform_indices = @transform_5, window_bounds = array<i64: 32, 32>}, {pipeline_mode = #tpu.pipeline_mode<synchronous>, transform_indices = @transform_6, window_bounds = array<i64: 9, 32>}, {pipeline_mode = #tpu.pipeline_mode<synchronous>, transform_indices = @transform_7, window_bounds = array<i64: 16, 32>}]} {
    %c0 = arith.constant 0 : index
    %c0_0 = arith.constant 0 : index
    %0 = vector.load %arg7[%c0, %c0_0] : memref<9x32xf32, #tpu.memory_space<vmem>>, vector<9x32xf32>
    %1 = vector.extract_strided_slice %0 {offsets = [0, 0], sizes = [1, 32], strides = [1, 1]} : vector<9x32xf32> to vector<1x32xf32>
    %2 = vector.extract_strided_slice %0 {offsets = [1, 0], sizes = [1, 32], strides = [1, 1]} : vector<9x32xf32> to vector<1x32xf32>
    %3 = vector.extract_strided_slice %0 {offsets = [2, 0], sizes = [1, 32], strides = [1, 1]} : vector<9x32xf32> to vector<1x32xf32>
    %4 = vector.extract_strided_slice %0 {offsets = [3, 0], sizes = [1, 32], strides = [1, 1]} : vector<9x32xf32> to vector<1x32xf32>
    %5 = vector.extract_strided_slice %0 {offsets = [4, 0], sizes = [1, 32], strides = [1, 1]} : vector<9x32xf32> to vector<1x32xf32>
    %6 = vector.extract_strided_slice %0 {offsets = [5, 0], sizes = [1, 32], strides = [1, 1]} : vector<9x32xf32> to vector<1x32xf32>
    %7 = vector.extract_strided_slice %0 {offsets = [6, 0], sizes = [1, 32], strides = [1, 1]} : vector<9x32xf32> to vector<1x32xf32>
    %8 = vector.extract_strided_slice %0 {offsets = [7, 0], sizes = [1, 32], strides = [1, 1]} : vector<9x32xf32> to vector<1x32xf32>
    %9 = vector.extract_strided_slice %0 {offsets = [8, 0], sizes = [1, 32], strides = [1, 1]} : vector<9x32xf32> to vector<1x32xf32>
    %c0_1 = arith.constant 0 : index
    %c0_2 = arith.constant 0 : index
    %10 = vector.load %arg2[%c0_1, %c0_2] : memref<16x32xf32, #tpu.memory_space<vmem>>, vector<16x32xf32>
    %c0_3 = arith.constant 0 : index
    %c0_4 = arith.constant 0 : index
    %11 = vector.load %arg1[%c0_3, %c0_4] : memref<16x32xf32, #tpu.memory_space<vmem>>, vector<16x32xf32>
    %c0_5 = arith.constant 0 : index
    %c0_6 = arith.constant 0 : index
    %12 = vector.load %arg3[%c0_5, %c0_6] : memref<32x32xf32, #tpu.memory_space<vmem>>, vector<32x32xf32>
    %cst = arith.constant dense<0.000000e+00> : vector<16x32xf32>
    %13 = tpu.matmul %10, %12, %cst {dimension_numbers = #tpu.dot_dimension_numbers<[1], [0], [0], [1], [0, 0, 1, 1], [], []>} : vector<16x32xf32>, vector<32x32xf32>, vector<16x32xf32> -> vector<16x32xf32>
    %14 = vector.broadcast %1 : vector<1x32xf32> to vector<16x32xf32>
    %15 = arith.addf %13, %14 : vector<16x32xf32>
    %cst_7 = arith.constant 0.176776692 : f32
    %16 = vector.broadcast %cst_7 : f32 to vector<16x32xf32>
    %17 = arith.mulf %15, %16 : vector<16x32xf32>
    %c0_8 = arith.constant 0 : index
    %c0_9 = arith.constant 0 : index
    %18 = vector.load %arg4[%c0_8, %c0_9] : memref<32x64xf32, #tpu.memory_space<vmem>>, vector<32x64xf32>
    %cst_10 = arith.constant dense<0.000000e+00> : vector<16x64xf32>
    %19 = tpu.matmul %11, %18, %cst_10 {dimension_numbers = #tpu.dot_dimension_numbers<[1], [0], [0], [1], [0, 0, 1, 1], [], []>} : vector<16x32xf32>, vector<32x64xf32>, vector<16x64xf32> -> vector<16x64xf32>
    %20 = vector.extract_strided_slice %19 {offsets = [0, 0], sizes = [16, 32], strides = [1, 1]} : vector<16x64xf32> to vector<16x32xf32>
    %21 = vector.broadcast %2 : vector<1x32xf32> to vector<16x32xf32>
    %22 = arith.addf %20, %21 : vector<16x32xf32>
    %23 = vector.extract_strided_slice %19 {offsets = [0, 32], sizes = [16, 32], strides = [1, 1]} : vector<16x64xf32> to vector<16x32xf32>
    %24 = vector.broadcast %3 : vector<1x32xf32> to vector<16x32xf32>
    %25 = arith.addf %23, %24 : vector<16x32xf32>
    %26 = vector.shape_cast %17 : vector<16x32xf32> to vector<2x8x32xf32>
    %27 = vector.shape_cast %22 : vector<16x32xf32> to vector<2x8x32xf32>
    %28 = vector.shape_cast %25 : vector<16x32xf32> to vector<2x8x32xf32>
    %29 = vector.extract_strided_slice %26 {offsets = [0, 0, 0], sizes = [2, 8, 4], strides = [1, 1, 1]} : vector<2x8x32xf32> to vector<2x8x4xf32>
    %30 = vector.extract_strided_slice %27 {offsets = [0, 0, 0], sizes = [2, 8, 4], strides = [1, 1, 1]} : vector<2x8x32xf32> to vector<2x8x4xf32>
    %31 = vector.extract_strided_slice %28 {offsets = [0, 0, 0], sizes = [2, 8, 4], strides = [1, 1, 1]} : vector<2x8x32xf32> to vector<2x8x4xf32>
    "tpu.trace_start"() <{level = 10 : i32, message = "bnd,bmd->bnm"}> : () -> ()
    %cst_11 = arith.constant dense<0.000000e+00> : vector<2x8x8xf32>
    %32 = tpu.matmul %29, %30, %cst_11 {dimension_numbers = #tpu.dot_dimension_numbers<[2], [2], [1], [1], [0, 0, 0, 1, 1, 1], [0], [0]>} : vector<2x8x4xf32>, vector<2x8x4xf32>, vector<2x8x8xf32> -> vector<2x8x8xf32>
    "tpu.trace_stop"() : () -> ()
    %cst_12 = arith.constant dense<0xFF800000> : vector<2x8xf32>
    %33 = vector.multi_reduction <maximumf>, %32, %cst_12 [2] : vector<2x8x8xf32> to vector<2x8xf32>
    %34 = vector.shape_cast %33 : vector<2x8xf32> to vector<2x8x1xf32>
    %35 = vector.broadcast %34 : vector<2x8x1xf32> to vector<2x8x8xf32>
    %36 = arith.cmpf oge, %32, %35 : vector<2x8x8xf32>
    %cst_13 = arith.constant -1.000000e+30 : f32
    %37 = vector.broadcast %cst_13 : f32 to vector<2x8x8xf32>
    %38 = arith.select %36, %37, %32 : vector<2x8x8xi1>, vector<2x8x8xf32>
    %cst_14 = arith.constant dense<0xFF800000> : vector<2x8xf32>
    %39 = vector.multi_reduction <maximumf>, %38, %cst_14 [2] : vector<2x8x8xf32> to vector<2x8xf32>
    %40 = vector.shape_cast %39 : vector<2x8xf32> to vector<2x8x1xf32>
    %41 = vector.broadcast %40 : vector<2x8x1xf32> to vector<2x8x8xf32>
    %42 = arith.cmpf oge, %38, %41 : vector<2x8x8xf32>
    %cst_15 = arith.constant -1.000000e+30 : f32
    %43 = vector.broadcast %cst_15 : f32 to vector<2x8x8xf32>
    %44 = arith.select %42, %43, %38 : vector<2x8x8xi1>, vector<2x8x8xf32>
    %cst_16 = arith.constant dense<0xFF800000> : vector<2x8xf32>
    %45 = vector.multi_reduction <maximumf>, %44, %cst_16 [2] : vector<2x8x8xf32> to vector<2x8xf32>
    %46 = vector.shape_cast %45 : vector<2x8xf32> to vector<2x8x1xf32>
    %47 = vector.broadcast %46 : vector<2x8x1xf32> to vector<2x8x8xf32>
    %48 = arith.cmpf oge, %32, %47 : vector<2x8x8xf32>
    %49 = vector.broadcast %34 : vector<2x8x1xf32> to vector<2x8x8xf32>
    %50 = arith.subf %32, %49 : vector<2x8x8xf32>
    %51 = math.exp %50 : vector<2x8x8xf32>
    %cst_17 = arith.constant 0.000000e+00 : f32
    %52 = vector.broadcast %cst_17 : f32 to vector<2x8x8xf32>
    %53 = arith.select %48, %51, %52 : vector<2x8x8xi1>, vector<2x8x8xf32>
    %cst_18 = arith.constant dense<0.000000e+00> : vector<2x8xf32>
    %54 = vector.multi_reduction <add>, %53, %cst_18 [2] : vector<2x8x8xf32> to vector<2x8xf32>
    %55 = vector.shape_cast %54 : vector<2x8xf32> to vector<2x8x1xf32>
    %56 = tpu.reciprocal %55 {approx = true} : vector<2x8x1xf32> -> vector<2x8x1xf32>
    %57 = vector.broadcast %56 : vector<2x8x1xf32> to vector<2x8x8xf32>
    %58 = arith.mulf %53, %57 : vector<2x8x8xf32>
    "tpu.trace_start"() <{level = 10 : i32, message = "bnm,bmd->bnd"}> : () -> ()
    %cst_19 = arith.constant dense<0.000000e+00> : vector<2x8x4xf32>
    %59 = tpu.matmul %58, %31, %cst_19 {dimension_numbers = #tpu.dot_dimension_numbers<[2], [1], [1], [2], [0, 0, 0, 1, 1, 2], [0], [0]>} : vector<2x8x8xf32>, vector<2x8x4xf32>, vector<2x8x4xf32> -> vector<2x8x4xf32>
    "tpu.trace_stop"() : () -> ()
    %c0_20 = arith.constant 0 : index
    %c0_21 = arith.constant 0 : index
    %c0_22 = arith.constant 0 : index
    %60 = vector.load %arg9[%c0_20, %c0_21, %c0_22] : memref<2x8x32xf32, #tpu.memory_space<vmem>>, vector<2x8x4xf32>
    tpu.vector_store %arg9[%c0_20, %c0_21, %c0_22], %59 {strides = array<i32>} : memref<2x8x32xf32, #tpu.memory_space<vmem>>, vector<2x8x4xf32>,
    %61 = vector.extract_strided_slice %26 {offsets = [0, 0, 4], sizes = [2, 8, 4], strides = [1, 1, 1]} : vector<2x8x32xf32> to vector<2x8x4xf32>
    %62 = vector.extract_strided_slice %27 {offsets = [0, 0, 4], sizes = [2, 8, 4], strides = [1, 1, 1]} : vector<2x8x32xf32> to vector<2x8x4xf32>
    %63 = vector.extract_strided_slice %28 {offsets = [0, 0, 4], sizes = [2, 8, 4], strides = [1, 1, 1]} : vector<2x8x32xf32> to vector<2x8x4xf32>
    "tpu.trace_start"() <{level = 10 : i32, message = "bnd,bmd->bnm"}> : () -> ()
    %cst_23 = arith.constant dense<0.000000e+00> : vector<2x8x8xf32>
    %64 = tpu.matmul %61, %62, %cst_23 {dimension_numbers = #tpu.dot_dimension_numbers<[2], [2], [1], [1], [0, 0, 0, 1, 1, 1], [0], [0]>} : vector<2x8x4xf32>, vector<2x8x4xf32>, vector<2x8x8xf32> -> vector<2x8x8xf32>
    "tpu.trace_stop"() : () -> ()
    %cst_24 = arith.constant dense<0xFF800000> : vector<2x8xf32>
    %65 = vector.multi_reduction <maximumf>, %64, %cst_24 [2] : vector<2x8x8xf32> to vector<2x8xf32>
    %66 = vector.shape_cast %65 : vector<2x8xf32> to vector<2x8x1xf32>
    %67 = vector.broadcast %66 : vector<2x8x1xf32> to vector<2x8x8xf32>
    %68 = arith.cmpf oge, %64, %67 : vector<2x8x8xf32>
    %cst_25 = arith.constant -1.000000e+30 : f32
    %69 = vector.broadcast %cst_25 : f32 to vector<2x8x8xf32>
    %70 = arith.select %68, %69, %64 : vector<2x8x8xi1>, vector<2x8x8xf32>
    %cst_26 = arith.constant dense<0xFF800000> : vector<2x8xf32>
    %71 = vector.multi_reduction <maximumf>, %70, %cst_26 [2] : vector<2x8x8xf32> to vector<2x8xf32>
    %72 = vector.shape_cast %71 : vector<2x8xf32> to vector<2x8x1xf32>
    %73 = vector.broadcast %72 : vector<2x8x1xf32> to vector<2x8x8xf32>
    %74 = arith.cmpf oge, %70, %73 : vector<2x8x8xf32>
    %cst_27 = arith.constant -1.000000e+30 : f32
    %75 = vector.broadcast %cst_27 : f32 to vector<2x8x8xf32>
    %76 = arith.select %74, %75, %70 : vector<2x8x8xi1>, vector<2x8x8xf32>
    %cst_28 = arith.constant dense<0xFF800000> : vector<2x8xf32>
    %77 = vector.multi_reduction <maximumf>, %76, %cst_28 [2] : vector<2x8x8xf32> to vector<2x8xf32>
    %78 = vector.shape_cast %77 : vector<2x8xf32> to vector<2x8x1xf32>
    %79 = vector.broadcast %78 : vector<2x8x1xf32> to vector<2x8x8xf32>
    %80 = arith.cmpf oge, %64, %79 : vector<2x8x8xf32>
    %81 = vector.broadcast %66 : vector<2x8x1xf32> to vector<2x8x8xf32>
    %82 = arith.subf %64, %81 : vector<2x8x8xf32>
    %83 = math.exp %82 : vector<2x8x8xf32>
    %cst_29 = arith.constant 0.000000e+00 : f32
    %84 = vector.broadcast %cst_29 : f32 to vector<2x8x8xf32>
    %85 = arith.select %80, %83, %84 : vector<2x8x8xi1>, vector<2x8x8xf32>
    %cst_30 = arith.constant dense<0.000000e+00> : vector<2x8xf32>
    %86 = vector.multi_reduction <add>, %85, %cst_30 [2] : vector<2x8x8xf32> to vector<2x8xf32>
    %87 = vector.shape_cast %86 : vector<2x8xf32> to vector<2x8x1xf32>
    %88 = tpu.reciprocal %87 {approx = true} : vector<2x8x1xf32> -> vector<2x8x1xf32>
    %89 = vector.broadcast %88 : vector<2x8x1xf32> to vector<2x8x8xf32>
    %90 = arith.mulf %85, %89 : vector<2x8x8xf32>
    "tpu.trace_start"() <{level = 10 : i32, message = "bnm,bmd->bnd"}> : () -> ()
    %cst_31 = arith.constant dense<0.000000e+00> : vector<2x8x4xf32>
    %91 = tpu.matmul %90, %63, %cst_31 {dimension_numbers = #tpu.dot_dimension_numbers<[2], [1], [1], [2], [0, 0, 0, 1, 1, 2], [0], [0]>} : vector<2x8x8xf32>, vector<2x8x4xf32>, vector<2x8x4xf32> -> vector<2x8x4xf32>
    "tpu.trace_stop"() : () -> ()
    %c0_32 = arith.constant 0 : index
    %c0_33 = arith.constant 0 : index
    %c4 = arith.constant 4 : index
    %92 = vector.load %arg9[%c0_32, %c0_33, %c4] : memref<2x8x32xf32, #tpu.memory_space<vmem>>, vector<2x8x4xf32>
    tpu.vector_store %arg9[%c0_32, %c0_33, %c4], %91 {strides = array<i32>} : memref<2x8x32xf32, #tpu.memory_space<vmem>>, vector<2x8x4xf32>,
    %93 = vector.extract_strided_slice %26 {offsets = [0, 0, 8], sizes = [2, 8, 4], strides = [1, 1, 1]} : vector<2x8x32xf32> to vector<2x8x4xf32>
    %94 = vector.extract_strided_slice %27 {offsets = [0, 0, 8], sizes = [2, 8, 4], strides = [1, 1, 1]} : vector<2x8x32xf32> to vector<2x8x4xf32>
    %95 = vector.extract_strided_slice %28 {offsets = [0, 0, 8], sizes = [2, 8, 4], strides = [1, 1, 1]} : vector<2x8x32xf32> to vector<2x8x4xf32>
    "tpu.trace_start"() <{level = 10 : i32, message = "bnd,bmd->bnm"}> : () -> ()
    %cst_34 = arith.constant dense<0.000000e+00> : vector<2x8x8xf32>
    %96 = tpu.matmul %93, %94, %cst_34 {dimension_numbers = #tpu.dot_dimension_numbers<[2], [2], [1], [1], [0, 0, 0, 1, 1, 1], [0], [0]>} : vector<2x8x4xf32>, vector<2x8x4xf32>, vector<2x8x8xf32> -> vector<2x8x8xf32>
    "tpu.trace_stop"() : () -> ()
    %cst_35 = arith.constant dense<0xFF800000> : vector<2x8xf32>
    %97 = vector.multi_reduction <maximumf>, %96, %cst_35 [2] : vector<2x8x8xf32> to vector<2x8xf32>
    %98 = vector.shape_cast %97 : vector<2x8xf32> to vector<2x8x1xf32>
    %99 = vector.broadcast %98 : vector<2x8x1xf32> to vector<2x8x8xf32>
    %100 = arith.cmpf oge, %96, %99 : vector<2x8x8xf32>
    %cst_36 = arith.constant -1.000000e+30 : f32
    %101 = vector.broadcast %cst_36 : f32 to vector<2x8x8xf32>
    %102 = arith.select %100, %101, %96 : vector<2x8x8xi1>, vector<2x8x8xf32>
    %cst_37 = arith.constant dense<0xFF800000> : vector<2x8xf32>
    %103 = vector.multi_reduction <maximumf>, %102, %cst_37 [2] : vector<2x8x8xf32> to vector<2x8xf32>
    %104 = vector.shape_cast %103 : vector<2x8xf32> to vector<2x8x1xf32>
    %105 = vector.broadcast %104 : vector<2x8x1xf32> to vector<2x8x8xf32>
    %106 = arith.cmpf oge, %102, %105 : vector<2x8x8xf32>
    %cst_38 = arith.constant -1.000000e+30 : f32
    %107 = vector.broadcast %cst_38 : f32 to vector<2x8x8xf32>
    %108 = arith.select %106, %107, %102 : vector<2x8x8xi1>, vector<2x8x8xf32>
    %cst_39 = arith.constant dense<0xFF800000> : vector<2x8xf32>
    %109 = vector.multi_reduction <maximumf>, %108, %cst_39 [2] : vector<2x8x8xf32> to vector<2x8xf32>
    %110 = vector.shape_cast %109 : vector<2x8xf32> to vector<2x8x1xf32>
    %111 = vector.broadcast %110 : vector<2x8x1xf32> to vector<2x8x8xf32>
    %112 = arith.cmpf oge, %96, %111 : vector<2x8x8xf32>
    %113 = vector.broadcast %98 : vector<2x8x1xf32> to vector<2x8x8xf32>
    %114 = arith.subf %96, %113 : vector<2x8x8xf32>
    %115 = math.exp %114 : vector<2x8x8xf32>
    %cst_40 = arith.constant 0.000000e+00 : f32
    %116 = vector.broadcast %cst_40 : f32 to vector<2x8x8xf32>
    %117 = arith.select %112, %115, %116 : vector<2x8x8xi1>, vector<2x8x8xf32>
    %cst_41 = arith.constant dense<0.000000e+00> : vector<2x8xf32>
    %118 = vector.multi_reduction <add>, %117, %cst_41 [2] : vector<2x8x8xf32> to vector<2x8xf32>
    %119 = vector.shape_cast %118 : vector<2x8xf32> to vector<2x8x1xf32>
    %120 = tpu.reciprocal %119 {approx = true} : vector<2x8x1xf32> -> vector<2x8x1xf32>
    %121 = vector.broadcast %120 : vector<2x8x1xf32> to vector<2x8x8xf32>
    %122 = arith.mulf %117, %121 : vector<2x8x8xf32>
    "tpu.trace_start"() <{level = 10 : i32, message = "bnm,bmd->bnd"}> : () -> ()
    %cst_42 = arith.constant dense<0.000000e+00> : vector<2x8x4xf32>
    %123 = tpu.matmul %122, %95, %cst_42 {dimension_numbers = #tpu.dot_dimension_numbers<[2], [1], [1], [2], [0, 0, 0, 1, 1, 2], [0], [0]>} : vector<2x8x8xf32>, vector<2x8x4xf32>, vector<2x8x4xf32> -> vector<2x8x4xf32>
    "tpu.trace_stop"() : () -> ()
    %c0_43 = arith.constant 0 : index
    %c0_44 = arith.constant 0 : index
    %c8 = arith.constant 8 : index
    %124 = vector.load %arg9[%c0_43, %c0_44, %c8] : memref<2x8x32xf32, #tpu.memory_space<vmem>>, vector<2x8x4xf32>
    tpu.vector_store %arg9[%c0_43, %c0_44, %c8], %123 {strides = array<i32>} : memref<2x8x32xf32, #tpu.memory_space<vmem>>, vector<2x8x4xf32>,
    %125 = vector.extract_strided_slice %26 {offsets = [0, 0, 12], sizes = [2, 8, 4], strides = [1, 1, 1]} : vector<2x8x32xf32> to vector<2x8x4xf32>
    %126 = vector.extract_strided_slice %27 {offsets = [0, 0, 12], sizes = [2, 8, 4], strides = [1, 1, 1]} : vector<2x8x32xf32> to vector<2x8x4xf32>
    %127 = vector.extract_strided_slice %28 {offsets = [0, 0, 12], sizes = [2, 8, 4], strides = [1, 1, 1]} : vector<2x8x32xf32> to vector<2x8x4xf32>
    "tpu.trace_start"() <{level = 10 : i32, message = "bnd,bmd->bnm"}> : () -> ()
    %cst_45 = arith.constant dense<0.000000e+00> : vector<2x8x8xf32>
    %128 = tpu.matmul %125, %126, %cst_45 {dimension_numbers = #tpu.dot_dimension_numbers<[2], [2], [1], [1], [0, 0, 0, 1, 1, 1], [0], [0]>} : vector<2x8x4xf32>, vector<2x8x4xf32>, vector<2x8x8xf32> -> vector<2x8x8xf32>
    "tpu.trace_stop"() : () -> ()
    %cst_46 = arith.constant dense<0xFF800000> : vector<2x8xf32>
    %129 = vector.multi_reduction <maximumf>, %128, %cst_46 [2] : vector<2x8x8xf32> to vector<2x8xf32>
    %130 = vector.shape_cast %129 : vector<2x8xf32> to vector<2x8x1xf32>
    %131 = vector.broadcast %130 : vector<2x8x1xf32> to vector<2x8x8xf32>
    %132 = arith.cmpf oge, %128, %131 : vector<2x8x8xf32>
    %cst_47 = arith.constant -1.000000e+30 : f32
    %133 = vector.broadcast %cst_47 : f32 to vector<2x8x8xf32>
    %134 = arith.select %132, %133, %128 : vector<2x8x8xi1>, vector<2x8x8xf32>
    %cst_48 = arith.constant dense<0xFF800000> : vector<2x8xf32>
    %135 = vector.multi_reduction <maximumf>, %134, %cst_48 [2] : vector<2x8x8xf32> to vector<2x8xf32>
    %136 = vector.shape_cast %135 : vector<2x8xf32> to vector<2x8x1xf32>
    %137 = vector.broadcast %136 : vector<2x8x1xf32> to vector<2x8x8xf32>
    %138 = arith.cmpf oge, %134, %137 : vector<2x8x8xf32>
    %cst_49 = arith.constant -1.000000e+30 : f32
    %139 = vector.broadcast %cst_49 : f32 to vector<2x8x8xf32>
    %140 = arith.select %138, %139, %134 : vector<2x8x8xi1>, vector<2x8x8xf32>
    %cst_50 = arith.constant dense<0xFF800000> : vector<2x8xf32>
    %141 = vector.multi_reduction <maximumf>, %140, %cst_50 [2] : vector<2x8x8xf32> to vector<2x8xf32>
    %142 = vector.shape_cast %141 : vector<2x8xf32> to vector<2x8x1xf32>
    %143 = vector.broadcast %142 : vector<2x8x1xf32> to vector<2x8x8xf32>
    %144 = arith.cmpf oge, %128, %143 : vector<2x8x8xf32>
    %145 = vector.broadcast %130 : vector<2x8x1xf32> to vector<2x8x8xf32>
    %146 = arith.subf %128, %145 : vector<2x8x8xf32>
    %147 = math.exp %146 : vector<2x8x8xf32>
    %cst_51 = arith.constant 0.000000e+00 : f32
    %148 = vector.broadcast %cst_51 : f32 to vector<2x8x8xf32>
    %149 = arith.select %144, %147, %148 : vector<2x8x8xi1>, vector<2x8x8xf32>
    %cst_52 = arith.constant dense<0.000000e+00> : vector<2x8xf32>
    %150 = vector.multi_reduction <add>, %149, %cst_52 [2] : vector<2x8x8xf32> to vector<2x8xf32>
    %151 = vector.shape_cast %150 : vector<2x8xf32> to vector<2x8x1xf32>
    %152 = tpu.reciprocal %151 {approx = true} : vector<2x8x1xf32> -> vector<2x8x1xf32>
    %153 = vector.broadcast %152 : vector<2x8x1xf32> to vector<2x8x8xf32>
    %154 = arith.mulf %149, %153 : vector<2x8x8xf32>
    "tpu.trace_start"() <{level = 10 : i32, message = "bnm,bmd->bnd"}> : () -> ()
    %cst_53 = arith.constant dense<0.000000e+00> : vector<2x8x4xf32>
    %155 = tpu.matmul %154, %127, %cst_53 {dimension_numbers = #tpu.dot_dimension_numbers<[2], [1], [1], [2], [0, 0, 0, 1, 1, 2], [0], [0]>} : vector<2x8x8xf32>, vector<2x8x4xf32>, vector<2x8x4xf32> -> vector<2x8x4xf32>
    "tpu.trace_stop"() : () -> ()
    %c0_54 = arith.constant 0 : index
    %c0_55 = arith.constant 0 : index
    %c12 = arith.constant 12 : index
    %156 = vector.load %arg9[%c0_54, %c0_55, %c12] : memref<2x8x32xf32, #tpu.memory_space<vmem>>, vector<2x8x4xf32>
    tpu.vector_store %arg9[%c0_54, %c0_55, %c12], %155 {strides = array<i32>} : memref<2x8x32xf32, #tpu.memory_space<vmem>>, vector<2x8x4xf32>,
    %157 = vector.extract_strided_slice %26 {offsets = [0, 0, 16], sizes = [2, 8, 4], strides = [1, 1, 1]} : vector<2x8x32xf32> to vector<2x8x4xf32>
    %158 = vector.extract_strided_slice %27 {offsets = [0, 0, 16], sizes = [2, 8, 4], strides = [1, 1, 1]} : vector<2x8x32xf32> to vector<2x8x4xf32>
    %159 = vector.extract_strided_slice %28 {offsets = [0, 0, 16], sizes = [2, 8, 4], strides = [1, 1, 1]} : vector<2x8x32xf32> to vector<2x8x4xf32>
    "tpu.trace_start"() <{level = 10 : i32, message = "bnd,bmd->bnm"}> : () -> ()
    %cst_56 = arith.constant dense<0.000000e+00> : vector<2x8x8xf32>
    %160 = tpu.matmul %157, %158, %cst_56 {dimension_numbers = #tpu.dot_dimension_numbers<[2], [2], [1], [1], [0, 0, 0, 1, 1, 1], [0], [0]>} : vector<2x8x4xf32>, vector<2x8x4xf32>, vector<2x8x8xf32> -> vector<2x8x8xf32>
    "tpu.trace_stop"() : () -> ()
    %cst_57 = arith.constant dense<0xFF800000> : vector<2x8xf32>
    %161 = vector.multi_reduction <maximumf>, %160, %cst_57 [2] : vector<2x8x8xf32> to vector<2x8xf32>
    %162 = vector.shape_cast %161 : vector<2x8xf32> to vector<2x8x1xf32>
    %163 = vector.broadcast %162 : vector<2x8x1xf32> to vector<2x8x8xf32>
    %164 = arith.cmpf oge, %160, %163 : vector<2x8x8xf32>
    %cst_58 = arith.constant -1.000000e+30 : f32
    %165 = vector.broadcast %cst_58 : f32 to vector<2x8x8xf32>
    %166 = arith.select %164, %165, %160 : vector<2x8x8xi1>, vector<2x8x8xf32>
    %cst_59 = arith.constant dense<0xFF800000> : vector<2x8xf32>
    %167 = vector.multi_reduction <maximumf>, %166, %cst_59 [2] : vector<2x8x8xf32> to vector<2x8xf32>
    %168 = vector.shape_cast %167 : vector<2x8xf32> to vector<2x8x1xf32>
    %169 = vector.broadcast %168 : vector<2x8x1xf32> to vector<2x8x8xf32>
    %170 = arith.cmpf oge, %166, %169 : vector<2x8x8xf32>
    %cst_60 = arith.constant -1.000000e+30 : f32
    %171 = vector.broadcast %cst_60 : f32 to vector<2x8x8xf32>
    %172 = arith.select %170, %171, %166 : vector<2x8x8xi1>, vector<2x8x8xf32>
    %cst_61 = arith.constant dense<0xFF800000> : vector<2x8xf32>
    %173 = vector.multi_reduction <maximumf>, %172, %cst_61 [2] : vector<2x8x8xf32> to vector<2x8xf32>
    %174 = vector.shape_cast %173 : vector<2x8xf32> to vector<2x8x1xf32>
    %175 = vector.broadcast %174 : vector<2x8x1xf32> to vector<2x8x8xf32>
    %176 = arith.cmpf oge, %160, %175 : vector<2x8x8xf32>
    %177 = vector.broadcast %162 : vector<2x8x1xf32> to vector<2x8x8xf32>
    %178 = arith.subf %160, %177 : vector<2x8x8xf32>
    %179 = math.exp %178 : vector<2x8x8xf32>
    %cst_62 = arith.constant 0.000000e+00 : f32
    %180 = vector.broadcast %cst_62 : f32 to vector<2x8x8xf32>
    %181 = arith.select %176, %179, %180 : vector<2x8x8xi1>, vector<2x8x8xf32>
    %cst_63 = arith.constant dense<0.000000e+00> : vector<2x8xf32>
    %182 = vector.multi_reduction <add>, %181, %cst_63 [2] : vector<2x8x8xf32> to vector<2x8xf32>
    %183 = vector.shape_cast %182 : vector<2x8xf32> to vector<2x8x1xf32>
    %184 = tpu.reciprocal %183 {approx = true} : vector<2x8x1xf32> -> vector<2x8x1xf32>
    %185 = vector.broadcast %184 : vector<2x8x1xf32> to vector<2x8x8xf32>
    %186 = arith.mulf %181, %185 : vector<2x8x8xf32>
    "tpu.trace_start"() <{level = 10 : i32, message = "bnm,bmd->bnd"}> : () -> ()
    %cst_64 = arith.constant dense<0.000000e+00> : vector<2x8x4xf32>
    %187 = tpu.matmul %186, %159, %cst_64 {dimension_numbers = #tpu.dot_dimension_numbers<[2], [1], [1], [2], [0, 0, 0, 1, 1, 2], [0], [0]>} : vector<2x8x8xf32>, vector<2x8x4xf32>, vector<2x8x4xf32> -> vector<2x8x4xf32>
    "tpu.trace_stop"() : () -> ()
    %c0_65 = arith.constant 0 : index
    %c0_66 = arith.constant 0 : index
    %c16 = arith.constant 16 : index
    %188 = vector.load %arg9[%c0_65, %c0_66, %c16] : memref<2x8x32xf32, #tpu.memory_space<vmem>>, vector<2x8x4xf32>
    tpu.vector_store %arg9[%c0_65, %c0_66, %c16], %187 {strides = array<i32>} : memref<2x8x32xf32, #tpu.memory_space<vmem>>, vector<2x8x4xf32>,
    %189 = vector.extract_strided_slice %26 {offsets = [0, 0, 20], sizes = [2, 8, 4], strides = [1, 1, 1]} : vector<2x8x32xf32> to vector<2x8x4xf32>
    %190 = vector.extract_strided_slice %27 {offsets = [0, 0, 20], sizes = [2, 8, 4], strides = [1, 1, 1]} : vector<2x8x32xf32> to vector<2x8x4xf32>
    %191 = vector.extract_strided_slice %28 {offsets = [0, 0, 20], sizes = [2, 8, 4], strides = [1, 1, 1]} : vector<2x8x32xf32> to vector<2x8x4xf32>
    "tpu.trace_start"() <{level = 10 : i32, message = "bnd,bmd->bnm"}> : () -> ()
    %cst_67 = arith.constant dense<0.000000e+00> : vector<2x8x8xf32>
    %192 = tpu.matmul %189, %190, %cst_67 {dimension_numbers = #tpu.dot_dimension_numbers<[2], [2], [1], [1], [0, 0, 0, 1, 1, 1], [0], [0]>} : vector<2x8x4xf32>, vector<2x8x4xf32>, vector<2x8x8xf32> -> vector<2x8x8xf32>
    "tpu.trace_stop"() : () -> ()
    %cst_68 = arith.constant dense<0xFF800000> : vector<2x8xf32>
    %193 = vector.multi_reduction <maximumf>, %192, %cst_68 [2] : vector<2x8x8xf32> to vector<2x8xf32>
    %194 = vector.shape_cast %193 : vector<2x8xf32> to vector<2x8x1xf32>
    %195 = vector.broadcast %194 : vector<2x8x1xf32> to vector<2x8x8xf32>
    %196 = arith.cmpf oge, %192, %195 : vector<2x8x8xf32>
    %cst_69 = arith.constant -1.000000e+30 : f32
    %197 = vector.broadcast %cst_69 : f32 to vector<2x8x8xf32>
    %198 = arith.select %196, %197, %192 : vector<2x8x8xi1>, vector<2x8x8xf32>
    %cst_70 = arith.constant dense<0xFF800000> : vector<2x8xf32>
    %199 = vector.multi_reduction <maximumf>, %198, %cst_70 [2] : vector<2x8x8xf32> to vector<2x8xf32>
    %200 = vector.shape_cast %199 : vector<2x8xf32> to vector<2x8x1xf32>
    %201 = vector.broadcast %200 : vector<2x8x1xf32> to vector<2x8x8xf32>
    %202 = arith.cmpf oge, %198, %201 : vector<2x8x8xf32>
    %cst_71 = arith.constant -1.000000e+30 : f32
    %203 = vector.broadcast %cst_71 : f32 to vector<2x8x8xf32>
    %204 = arith.select %202, %203, %198 : vector<2x8x8xi1>, vector<2x8x8xf32>
    %cst_72 = arith.constant dense<0xFF800000> : vector<2x8xf32>
    %205 = vector.multi_reduction <maximumf>, %204, %cst_72 [2] : vector<2x8x8xf32> to vector<2x8xf32>
    %206 = vector.shape_cast %205 : vector<2x8xf32> to vector<2x8x1xf32>
    %207 = vector.broadcast %206 : vector<2x8x1xf32> to vector<2x8x8xf32>
    %208 = arith.cmpf oge, %192, %207 : vector<2x8x8xf32>
    %209 = vector.broadcast %194 : vector<2x8x1xf32> to vector<2x8x8xf32>
    %210 = arith.subf %192, %209 : vector<2x8x8xf32>
    %211 = math.exp %210 : vector<2x8x8xf32>
    %cst_73 = arith.constant 0.000000e+00 : f32
    %212 = vector.broadcast %cst_73 : f32 to vector<2x8x8xf32>
    %213 = arith.select %208, %211, %212 : vector<2x8x8xi1>, vector<2x8x8xf32>
    %cst_74 = arith.constant dense<0.000000e+00> : vector<2x8xf32>
    %214 = vector.multi_reduction <add>, %213, %cst_74 [2] : vector<2x8x8xf32> to vector<2x8xf32>
    %215 = vector.shape_cast %214 : vector<2x8xf32> to vector<2x8x1xf32>
    %216 = tpu.reciprocal %215 {approx = true} : vector<2x8x1xf32> -> vector<2x8x1xf32>
    %217 = vector.broadcast %216 : vector<2x8x1xf32> to vector<2x8x8xf32>
    %218 = arith.mulf %213, %217 : vector<2x8x8xf32>
    "tpu.trace_start"() <{level = 10 : i32, message = "bnm,bmd->bnd"}> : () -> ()
    %cst_75 = arith.constant dense<0.000000e+00> : vector<2x8x4xf32>
    %219 = tpu.matmul %218, %191, %cst_75 {dimension_numbers = #tpu.dot_dimension_numbers<[2], [1], [1], [2], [0, 0, 0, 1, 1, 2], [0], [0]>} : vector<2x8x8xf32>, vector<2x8x4xf32>, vector<2x8x4xf32> -> vector<2x8x4xf32>
    "tpu.trace_stop"() : () -> ()
    %c0_76 = arith.constant 0 : index
    %c0_77 = arith.constant 0 : index
    %c20 = arith.constant 20 : index
    %220 = vector.load %arg9[%c0_76, %c0_77, %c20] : memref<2x8x32xf32, #tpu.memory_space<vmem>>, vector<2x8x4xf32>
    tpu.vector_store %arg9[%c0_76, %c0_77, %c20], %219 {strides = array<i32>} : memref<2x8x32xf32, #tpu.memory_space<vmem>>, vector<2x8x4xf32>,
    %221 = vector.extract_strided_slice %26 {offsets = [0, 0, 24], sizes = [2, 8, 4], strides = [1, 1, 1]} : vector<2x8x32xf32> to vector<2x8x4xf32>
    %222 = vector.extract_strided_slice %27 {offsets = [0, 0, 24], sizes = [2, 8, 4], strides = [1, 1, 1]} : vector<2x8x32xf32> to vector<2x8x4xf32>
    %223 = vector.extract_strided_slice %28 {offsets = [0, 0, 24], sizes = [2, 8, 4], strides = [1, 1, 1]} : vector<2x8x32xf32> to vector<2x8x4xf32>
    "tpu.trace_start"() <{level = 10 : i32, message = "bnd,bmd->bnm"}> : () -> ()
    %cst_78 = arith.constant dense<0.000000e+00> : vector<2x8x8xf32>
    %224 = tpu.matmul %221, %222, %cst_78 {dimension_numbers = #tpu.dot_dimension_numbers<[2], [2], [1], [1], [0, 0, 0, 1, 1, 1], [0], [0]>} : vector<2x8x4xf32>, vector<2x8x4xf32>, vector<2x8x8xf32> -> vector<2x8x8xf32>
    "tpu.trace_stop"() : () -> ()
    %cst_79 = arith.constant dense<0xFF800000> : vector<2x8xf32>
    %225 = vector.multi_reduction <maximumf>, %224, %cst_79 [2] : vector<2x8x8xf32> to vector<2x8xf32>
    %226 = vector.shape_cast %225 : vector<2x8xf32> to vector<2x8x1xf32>
    %227 = vector.broadcast %226 : vector<2x8x1xf32> to vector<2x8x8xf32>
    %228 = arith.cmpf oge, %224, %227 : vector<2x8x8xf32>
    %cst_80 = arith.constant -1.000000e+30 : f32
    %229 = vector.broadcast %cst_80 : f32 to vector<2x8x8xf32>
    %230 = arith.select %228, %229, %224 : vector<2x8x8xi1>, vector<2x8x8xf32>
    %cst_81 = arith.constant dense<0xFF800000> : vector<2x8xf32>
    %231 = vector.multi_reduction <maximumf>, %230, %cst_81 [2] : vector<2x8x8xf32> to vector<2x8xf32>
    %232 = vector.shape_cast %231 : vector<2x8xf32> to vector<2x8x1xf32>
    %233 = vector.broadcast %232 : vector<2x8x1xf32> to vector<2x8x8xf32>
    %234 = arith.cmpf oge, %230, %233 : vector<2x8x8xf32>
    %cst_82 = arith.constant -1.000000e+30 : f32
    %235 = vector.broadcast %cst_82 : f32 to vector<2x8x8xf32>
    %236 = arith.select %234, %235, %230 : vector<2x8x8xi1>, vector<2x8x8xf32>
    %cst_83 = arith.constant dense<0xFF800000> : vector<2x8xf32>
    %237 = vector.multi_reduction <maximumf>, %236, %cst_83 [2] : vector<2x8x8xf32> to vector<2x8xf32>
    %238 = vector.shape_cast %237 : vector<2x8xf32> to vector<2x8x1xf32>
    %239 = vector.broadcast %238 : vector<2x8x1xf32> to vector<2x8x8xf32>
    %240 = arith.cmpf oge, %224, %239 : vector<2x8x8xf32>
    %241 = vector.broadcast %226 : vector<2x8x1xf32> to vector<2x8x8xf32>
    %242 = arith.subf %224, %241 : vector<2x8x8xf32>
    %243 = math.exp %242 : vector<2x8x8xf32>
    %cst_84 = arith.constant 0.000000e+00 : f32
    %244 = vector.broadcast %cst_84 : f32 to vector<2x8x8xf32>
    %245 = arith.select %240, %243, %244 : vector<2x8x8xi1>, vector<2x8x8xf32>
    %cst_85 = arith.constant dense<0.000000e+00> : vector<2x8xf32>
    %246 = vector.multi_reduction <add>, %245, %cst_85 [2] : vector<2x8x8xf32> to vector<2x8xf32>
    %247 = vector.shape_cast %246 : vector<2x8xf32> to vector<2x8x1xf32>
    %248 = tpu.reciprocal %247 {approx = true} : vector<2x8x1xf32> -> vector<2x8x1xf32>
    %249 = vector.broadcast %248 : vector<2x8x1xf32> to vector<2x8x8xf32>
    %250 = arith.mulf %245, %249 : vector<2x8x8xf32>
    "tpu.trace_start"() <{level = 10 : i32, message = "bnm,bmd->bnd"}> : () -> ()
    %cst_86 = arith.constant dense<0.000000e+00> : vector<2x8x4xf32>
    %251 = tpu.matmul %250, %223, %cst_86 {dimension_numbers = #tpu.dot_dimension_numbers<[2], [1], [1], [2], [0, 0, 0, 1, 1, 2], [0], [0]>} : vector<2x8x8xf32>, vector<2x8x4xf32>, vector<2x8x4xf32> -> vector<2x8x4xf32>
    "tpu.trace_stop"() : () -> ()
    %c0_87 = arith.constant 0 : index
    %c0_88 = arith.constant 0 : index
    %c24 = arith.constant 24 : index
    %252 = vector.load %arg9[%c0_87, %c0_88, %c24] : memref<2x8x32xf32, #tpu.memory_space<vmem>>, vector<2x8x4xf32>
    tpu.vector_store %arg9[%c0_87, %c0_88, %c24], %251 {strides = array<i32>} : memref<2x8x32xf32, #tpu.memory_space<vmem>>, vector<2x8x4xf32>,
    %253 = vector.extract_strided_slice %26 {offsets = [0, 0, 28], sizes = [2, 8, 4], strides = [1, 1, 1]} : vector<2x8x32xf32> to vector<2x8x4xf32>
    %254 = vector.extract_strided_slice %27 {offsets = [0, 0, 28], sizes = [2, 8, 4], strides = [1, 1, 1]} : vector<2x8x32xf32> to vector<2x8x4xf32>
    %255 = vector.extract_strided_slice %28 {offsets = [0, 0, 28], sizes = [2, 8, 4], strides = [1, 1, 1]} : vector<2x8x32xf32> to vector<2x8x4xf32>
    "tpu.trace_start"() <{level = 10 : i32, message = "bnd,bmd->bnm"}> : () -> ()
    %cst_89 = arith.constant dense<0.000000e+00> : vector<2x8x8xf32>
    %256 = tpu.matmul %253, %254, %cst_89 {dimension_numbers = #tpu.dot_dimension_numbers<[2], [2], [1], [1], [0, 0, 0, 1, 1, 1], [0], [0]>} : vector<2x8x4xf32>, vector<2x8x4xf32>, vector<2x8x8xf32> -> vector<2x8x8xf32>
    "tpu.trace_stop"() : () -> ()
    %cst_90 = arith.constant dense<0xFF800000> : vector<2x8xf32>
    %257 = vector.multi_reduction <maximumf>, %256, %cst_90 [2] : vector<2x8x8xf32> to vector<2x8xf32>
    %258 = vector.shape_cast %257 : vector<2x8xf32> to vector<2x8x1xf32>
    %259 = vector.broadcast %258 : vector<2x8x1xf32> to vector<2x8x8xf32>
    %260 = arith.cmpf oge, %256, %259 : vector<2x8x8xf32>
    %cst_91 = arith.constant -1.000000e+30 : f32
    %261 = vector.broadcast %cst_91 : f32 to vector<2x8x8xf32>
    %262 = arith.select %260, %261, %256 : vector<2x8x8xi1>, vector<2x8x8xf32>
    %cst_92 = arith.constant dense<0xFF800000> : vector<2x8xf32>
    %263 = vector.multi_reduction <maximumf>, %262, %cst_92 [2] : vector<2x8x8xf32> to vector<2x8xf32>
    %264 = vector.shape_cast %263 : vector<2x8xf32> to vector<2x8x1xf32>
    %265 = vector.broadcast %264 : vector<2x8x1xf32> to vector<2x8x8xf32>
    %266 = arith.cmpf oge, %262, %265 : vector<2x8x8xf32>
    %cst_93 = arith.constant -1.000000e+30 : f32
    %267 = vector.broadcast %cst_93 : f32 to vector<2x8x8xf32>
    %268 = arith.select %266, %267, %262 : vector<2x8x8xi1>, vector<2x8x8xf32>
    %cst_94 = arith.constant dense<0xFF800000> : vector<2x8xf32>
    %269 = vector.multi_reduction <maximumf>, %268, %cst_94 [2] : vector<2x8x8xf32> to vector<2x8xf32>
    %270 = vector.shape_cast %269 : vector<2x8xf32> to vector<2x8x1xf32>
    %271 = vector.broadcast %270 : vector<2x8x1xf32> to vector<2x8x8xf32>
    %272 = arith.cmpf oge, %256, %271 : vector<2x8x8xf32>
    %273 = vector.broadcast %258 : vector<2x8x1xf32> to vector<2x8x8xf32>
    %274 = arith.subf %256, %273 : vector<2x8x8xf32>
    %275 = math.exp %274 : vector<2x8x8xf32>
    %cst_95 = arith.constant 0.000000e+00 : f32
    %276 = vector.broadcast %cst_95 : f32 to vector<2x8x8xf32>
    %277 = arith.select %272, %275, %276 : vector<2x8x8xi1>, vector<2x8x8xf32>
    %cst_96 = arith.constant dense<0.000000e+00> : vector<2x8xf32>
    %278 = vector.multi_reduction <add>, %277, %cst_96 [2] : vector<2x8x8xf32> to vector<2x8xf32>
    %279 = vector.shape_cast %278 : vector<2x8xf32> to vector<2x8x1xf32>
    %280 = tpu.reciprocal %279 {approx = true} : vector<2x8x1xf32> -> vector<2x8x1xf32>
    %281 = vector.broadcast %280 : vector<2x8x1xf32> to vector<2x8x8xf32>
    %282 = arith.mulf %277, %281 : vector<2x8x8xf32>
    "tpu.trace_start"() <{level = 10 : i32, message = "bnm,bmd->bnd"}> : () -> ()
    %cst_97 = arith.constant dense<0.000000e+00> : vector<2x8x4xf32>
    %283 = tpu.matmul %282, %255, %cst_97 {dimension_numbers = #tpu.dot_dimension_numbers<[2], [1], [1], [2], [0, 0, 0, 1, 1, 2], [0], [0]>} : vector<2x8x8xf32>, vector<2x8x4xf32>, vector<2x8x4xf32> -> vector<2x8x4xf32>
    "tpu.trace_stop"() : () -> ()
    %c0_98 = arith.constant 0 : index
    %c0_99 = arith.constant 0 : index
    %c28 = arith.constant 28 : index
    %284 = vector.load %arg9[%c0_98, %c0_99, %c28] : memref<2x8x32xf32, #tpu.memory_space<vmem>>, vector<2x8x4xf32>
    tpu.vector_store %arg9[%c0_98, %c0_99, %c28], %283 {strides = array<i32>} : memref<2x8x32xf32, #tpu.memory_space<vmem>>, vector<2x8x4xf32>,
    %c0_100 = arith.constant 0 : index
    %c0_101 = arith.constant 0 : index
    %c0_102 = arith.constant 0 : index
    %285 = vector.load %arg9[%c0_100, %c0_101, %c0_102] : memref<2x8x32xf32, #tpu.memory_space<vmem>>, vector<2x8x32xf32>
    %286 = vector.shape_cast %285 : vector<2x8x32xf32> to vector<16x32xf32>
    %287 = arith.addf %10, %286 : vector<16x32xf32>
    %cst_103 = arith.constant dense<0.000000e+00> : vector<16xf32>
    %288 = vector.multi_reduction <add>, %287, %cst_103 [1] : vector<16x32xf32> to vector<16xf32>
    %289 = vector.shape_cast %288 : vector<16xf32> to vector<16x1xf32>
    %cst_104 = arith.constant 3.200000e+01 : f32
    %290 = vector.broadcast %cst_104 : f32 to vector<16x1xf32>
    %291 = arith.divf %289, %290 : vector<16x1xf32>
    %292 = vector.broadcast %291 : vector<16x1xf32> to vector<16x32xf32>
    %293 = arith.subf %287, %292 : vector<16x32xf32>
    %294 = arith.mulf %293, %293 : vector<16x32xf32>
    %cst_105 = arith.constant dense<0.000000e+00> : vector<16xf32>
    %295 = vector.multi_reduction <add>, %294, %cst_105 [1] : vector<16x32xf32> to vector<16xf32>
    %296 = vector.shape_cast %295 : vector<16xf32> to vector<16x1xf32>
    %cst_106 = arith.constant 3.200000e+01 : f32
    %297 = vector.broadcast %cst_106 : f32 to vector<16x1xf32>
    %298 = arith.divf %296, %297 : vector<16x1xf32>
    %299 = vector.broadcast %291 : vector<16x1xf32> to vector<16x32xf32>
    %300 = arith.subf %287, %299 : vector<16x32xf32>
    %cst_107 = arith.constant 9.99999974E-6 : f32
    %301 = vector.broadcast %cst_107 : f32 to vector<16x1xf32>
    %302 = arith.addf %298, %301 : vector<16x1xf32>
    %303 = math.rsqrt %302 : vector<16x1xf32>
    %304 = vector.broadcast %303 : vector<16x1xf32> to vector<16x32xf32>
    %305 = arith.mulf %300, %304 : vector<16x32xf32>
    %306 = vector.broadcast %6 : vector<1x32xf32> to vector<16x32xf32>
    %307 = arith.mulf %305, %306 : vector<16x32xf32>
    %308 = vector.broadcast %7 : vector<1x32xf32> to vector<16x32xf32>
    %309 = arith.addf %307, %308 : vector<16x32xf32>
    %c0_108 = arith.constant 0 : index
    %c0_109 = arith.constant 0 : index
    %310 = vector.load %arg5[%c0_108, %c0_109] : memref<32x32xf32, #tpu.memory_space<vmem>>, vector<32x32xf32>
    %cst_110 = arith.constant dense<0.000000e+00> : vector<16x32xf32>
    %311 = tpu.matmul %309, %310, %cst_110 {dimension_numbers = #tpu.dot_dimension_numbers<[1], [0], [0], [1], [0, 0, 1, 1], [], []>} : vector<16x32xf32>, vector<32x32xf32>, vector<16x32xf32> -> vector<16x32xf32>
    %312 = vector.broadcast %4 : vector<1x32xf32> to vector<16x32xf32>
    %313 = arith.addf %311, %312 : vector<16x32xf32>
    %cst_111 = arith.constant 0.000000e+00 : f32
    %314 = vector.broadcast %cst_111 : f32 to vector<16x32xf32>
    %315 = arith.maximumf %313, %314 : vector<16x32xf32>
    %c0_112 = arith.constant 0 : index
    %c0_113 = arith.constant 0 : index
    %316 = vector.load %arg6[%c0_112, %c0_113] : memref<32x32xf32, #tpu.memory_space<vmem>>, vector<32x32xf32>
    %cst_114 = arith.constant dense<0.000000e+00> : vector<16x32xf32>
    %317 = tpu.matmul %315, %316, %cst_114 {dimension_numbers = #tpu.dot_dimension_numbers<[1], [0], [0], [1], [0, 0, 1, 1], [], []>} : vector<16x32xf32>, vector<32x32xf32>, vector<16x32xf32> -> vector<16x32xf32>
    %318 = vector.broadcast %5 : vector<1x32xf32> to vector<16x32xf32>
    %319 = arith.addf %317, %318 : vector<16x32xf32>
    %320 = arith.addf %309, %319 : vector<16x32xf32>
    %cst_115 = arith.constant dense<0.000000e+00> : vector<16xf32>
    %321 = vector.multi_reduction <add>, %320, %cst_115 [1] : vector<16x32xf32> to vector<16xf32>
    %322 = vector.shape_cast %321 : vector<16xf32> to vector<16x1xf32>
    %cst_116 = arith.constant 3.200000e+01 : f32
    %323 = vector.broadcast %cst_116 : f32 to vector<16x1xf32>
    %324 = arith.divf %322, %323 : vector<16x1xf32>
    %325 = vector.broadcast %324 : vector<16x1xf32> to vector<16x32xf32>
    %326 = arith.subf %320, %325 : vector<16x32xf32>
    %327 = arith.mulf %326, %326 : vector<16x32xf32>
    %cst_117 = arith.constant dense<0.000000e+00> : vector<16xf32>
    %328 = vector.multi_reduction <add>, %327, %cst_117 [1] : vector<16x32xf32> to vector<16xf32>
    %329 = vector.shape_cast %328 : vector<16xf32> to vector<16x1xf32>
    %cst_118 = arith.constant 3.200000e+01 : f32
    %330 = vector.broadcast %cst_118 : f32 to vector<16x1xf32>
    %331 = arith.divf %329, %330 : vector<16x1xf32>
    %332 = vector.broadcast %324 : vector<16x1xf32> to vector<16x32xf32>
    %333 = arith.subf %320, %332 : vector<16x32xf32>
    %cst_119 = arith.constant 9.99999974E-6 : f32
    %334 = vector.broadcast %cst_119 : f32 to vector<16x1xf32>
    %335 = arith.addf %331, %334 : vector<16x1xf32>
    %336 = math.rsqrt %335 : vector<16x1xf32>
    %337 = vector.broadcast %336 : vector<16x1xf32> to vector<16x32xf32>
    %338 = arith.mulf %333, %337 : vector<16x32xf32>
    %339 = vector.broadcast %8 : vector<1x32xf32> to vector<16x32xf32>
    %340 = arith.mulf %338, %339 : vector<16x32xf32>
    %341 = vector.broadcast %9 : vector<1x32xf32> to vector<16x32xf32>
    %342 = arith.addf %340, %341 : vector<16x32xf32>
    %c0_120 = arith.constant 0 : index
    %c0_121 = arith.constant 0 : index
    %343 = vector.load %arg8[%c0_120, %c0_121] : memref<16x32xf32, #tpu.memory_space<vmem>>, vector<16x32xf32>
    tpu.vector_store %arg8[%c0_120, %c0_121], %342 {strides = array<i32>} : memref<16x32xf32, #tpu.memory_space<vmem>>, vector<16x32xf32>,
    return
  }
  func.func @transform_0(%arg0: i32) -> (i32, i32) {
    %c0_i32 = arith.constant 0 : i32
    %c0_i32_0 = arith.constant 0 : i32
    %c0_i32_1 = arith.constant 0 : i32
    return %c0_i32, %c0_i32_0 : i32, i32
  }
  func.func @transform_1(%arg0: i32) -> (i32, i32) {
    %c0_i32 = arith.constant 0 : i32
    %c0_i32_0 = arith.constant 0 : i32
    %c0_i32_1 = arith.constant 0 : i32
    return %c0_i32, %c0_i32_0 : i32, i32
  }
  func.func @transform_2(%arg0: i32) -> (i32, i32) {
    %c0_i32 = arith.constant 0 : i32
    %c0_i32_0 = arith.constant 0 : i32
    %c0_i32_1 = arith.constant 0 : i32
    return %c0_i32, %c0_i32_0 : i32, i32
  }
  func.func @transform_3(%arg0: i32) -> (i32, i32) {
    %c0_i32 = arith.constant 0 : i32
    %c0_i32_0 = arith.constant 0 : i32
    %c0_i32_1 = arith.constant 0 : i32
    return %c0_i32, %c0_i32_0 : i32, i32
  }
  func.func @transform_4(%arg0: i32) -> (i32, i32) {
    %c0_i32 = arith.constant 0 : i32
    %c0_i32_0 = arith.constant 0 : i32
    %c0_i32_1 = arith.constant 0 : i32
    return %c0_i32, %c0_i32_0 : i32, i32
  }
  func.func @transform_5(%arg0: i32) -> (i32, i32) {
    %c0_i32 = arith.constant 0 : i32
    %c0_i32_0 = arith.constant 0 : i32
    %c0_i32_1 = arith.constant 0 : i32
    return %c0_i32, %c0_i32_0 : i32, i32
  }
  func.func @transform_6(%arg0: i32) -> (i32, i32) {
    %c0_i32 = arith.constant 0 : i32
    %c0_i32_0 = arith.constant 0 : i32
    %c0_i32_1 = arith.constant 0 : i32
    return %c0_i32, %c0_i32_0 : i32, i32
  }
  func.func @transform_7(%arg0: i32) -> (i32, i32) {
    %c0_i32 = arith.constant 0 : i32
    %c0_i32_0 = arith.constant 0 : i32
    %c0_i32_1 = arith.constant 0 : i32
    return %c0_i32, %c0_i32_0 : i32, i32
  }
}

</mosaic_0001>

<bundles_post_ra>
// kernel: tpu_custom_call.1
= control target key start
LH: loop header
LB: loop body
LE: loop exit
PB: predicated region body
PF: predicated region fallthrough
CT: control target
= control target key end

     0   :  { %12 = vsyncpa [#allocation4], 0  ;;  %s4610_s0 = inlined_call_operand.hbm [shape: f32[16,32], index: 0, kind: input, shape index: {}]   ;;  %s4611_s1 = inlined_call_operand.hbm [shape: f32[16,32], index: 1, kind: input, shape index: {}]   ;;  %s4612_s2 = inlined_call_operand.hbm [shape: f32[32,32], index: 2, kind: input, shape index: {}]   ;;  %s4613_s3 = inlined_call_operand.hbm [shape: f32[32,64], index: 3, kind: input, shape index: {}]   ;;  %s4614_s4 = inlined_call_operand.hbm [shape: f32[32,32], index: 4, kind: input, shape index: {}]   ;;  %s4615_s5 = inlined_call_operand.hbm [shape: f32[32,32], index: 5, kind: input, shape index: {}]   ;;  %s4616_s6 = inlined_call_operand.hbm [shape: f32[9,32], index: 6, kind: input, shape index: {}]   ;;  %s4617_s7 = inlined_call_operand.hbm [shape: f32[16,32], index: 7, kind: output, shape index: {}]  }
   0x1   :  { %13 = vsyncpa [#allocation7], 0 }
   0x2   :  { %14 = vsyncpa [#allocation10], 0 }
   0x3   :  { %15 = vsyncpa [#allocation13], 0 }
   0x4   :  { %16 = vsyncpa [#allocation5], 0  ;;  %s4145_s24 = smov [#allocation6]   ;;  %s4146_s26 = smov [#allocation9]  }
   0x5   :  { %s34_s25 = sshll.u32 %s4145_s24, 4  ;;  %s58_s27 = sshll.u32 %s4146_s26, 4  ;;  %s35_s25 = int_to_ptr.vmem [resolvable:$true] %s34_s25  ;;  %s59_s27 = int_to_ptr.vmem [resolvable:$true] %s58_s27 }
   0x6   :  { %s3983_s28 = scalar_lea.vmem %s35_s25, 256  ;;  %p3988_p1 = scmp.lt.s32.totalorder %s35_s25, %s35_s25 }
   0x7   :  { %p3984_p0 = scmp.ne.s32.totalorder %s35_s25, %s3983_s28  ;;  %p3989_p2 = scmp.lt.s32.totalorder %s3983_s28, %s3983_s28 }
   0x9   :  { %p3990_p3 = por %p3989_p2, %p3988_p1 }
   0xb   :  { %p3991_p4 = pnand %p3990_p3, %p3984_p0 }
   0xd   :  { %3994 = shalt.err (!%p3991_p4)
}
   0xe   :  { %s4147_s29 = smov 128   ;;  %s4148_s30 = smov 8  }
   0xf   :  { %40 = dma.hbm_to_vmem [thread:$0]  %s4611_s1, 256, %s35_s25, [#allocation7], %s4147_s29, %s4147_s29, %s4148_s30  }
  0x10   :  { %s4003_s10 = scalar_lea.vmem %s59_s27, 512  ;;  %p4008_p6 = scmp.lt.s32.totalorder %s59_s27, %s59_s27 }
  0x11   :  { %p4004_p5 = scmp.ne.s32.totalorder %s59_s27, %s4003_s10  ;;  %p4009_p7 = scmp.lt.s32.totalorder %s4003_s10, %s4003_s10 }
  0x13   :  { %p4010_p8 = por %p4009_p7, %p4008_p6 }
  0x15   :  { %p4011_p9 = pnand %p4010_p8, %p4004_p5 }
  0x17   :  { %4014 = shalt.err (!%p4011_p9)
}
  0x18   :  { %64 = dma.hbm_to_vmem [thread:$0]  %s4613_s3, 512, %s59_s27, [#allocation10], %s4147_s29, %s4147_s29, %s4148_s30  }
  0x19   :  { %s4149_s13 = smov [#allocation12]   ;;  %s4150_s15 = smov [#allocation3]  }
  0x1a   :  { %s82_s14 = sshll.u32 %s4149_s13, 4  ;;  %s22_s16 = sshll.u32 %s4150_s15, 4  ;;  %s83_s14 = int_to_ptr.vmem [resolvable:$true] %s82_s14  ;;  %s23_s16 = int_to_ptr.vmem [resolvable:$true] %s22_s16 }
  0x1b   :  { %s4023_s1 = scalar_lea.vmem %s83_s14, 512  ;;  %p4028_p11 = scmp.lt.s32.totalorder %s83_s14, %s83_s14 }
  0x1c   :  { %p4024_p10 = scmp.ne.s32.totalorder %s83_s14, %s4023_s1  ;;  %p4029_p12 = scmp.lt.s32.totalorder %s4023_s1, %s4023_s1 }
  0x1e   :  { %p4030_p13 = por %p4029_p12, %p4028_p11 }
  0x20   :  { %p4031_p0 = pnand %p4030_p13, %p4024_p10 }
  0x22   :  { %4034 = shalt.err (!%p4031_p0)
}
  0x23   :  { %88 = dma.hbm_to_vmem [thread:$0]  %s4615_s5, 512, %s83_s14, [#allocation13], %s4147_s29, %s4147_s29, %s4148_s30  }
  0x24   :  { %s4043_s3 = scalar_lea.vmem %s23_s16, 256  ;;  %p4048_p2 = scmp.lt.s32.totalorder %s23_s16, %s23_s16 }
  0x25   :  { %p4044_p1 = scmp.ne.s32.totalorder %s23_s16, %s4043_s3  ;;  %p4049_p3 = scmp.lt.s32.totalorder %s4043_s3, %s4043_s3 }
  0x27   :  { %p4050_p4 = por %p4049_p3, %p4048_p2 }
  0x29   :  { %p4051_p5 = pnand %p4050_p4, %p4044_p1 }
  0x2b   :  { %4054 = shalt.err (!%p4051_p5)
}
  0x2c   :  { %28 = dma.hbm_to_vmem [thread:$0]  %s4610_s0, 256, %s23_s16, [#allocation4], %s4147_s29, %s4147_s29, %s4148_s30  }
  0x2d   :  { %s4151_s21 = smov [#allocation8]   ;;  %s4152_s23 = smov [#allocation11]  }
  0x2e   :  { %s46_s22 = sshll.u32 %s4151_s21, 4  ;;  %s70_s24 = sshll.u32 %s4152_s23, 4  ;;  %s47_s22 = int_to_ptr.vmem [resolvable:$true] %s46_s22  ;;  %s71_s24 = int_to_ptr.vmem [resolvable:$true] %s70_s24 }
  0x2f   :  { %s4063_s5 = scalar_lea.vmem %s47_s22, 512  ;;  %p4068_p7 = scmp.lt.s32.totalorder %s47_s22, %s47_s22 }
  0x30   :  { %p4064_p6 = scmp.ne.s32.totalorder %s47_s22, %s4063_s5  ;;  %p4069_p8 = scmp.lt.s32.totalorder %s4063_s5, %s4063_s5 }
  0x32   :  { %p4070_p9 = por %p4069_p8, %p4068_p7 }
  0x34   :  { %p4071_p10 = pnand %p4070_p9, %p4064_p6 }
  0x36   :  { %4074 = shalt.err (!%p4071_p10)
}
  0x37   :  { %52 = dma.hbm_to_vmem [thread:$0]  %s4612_s2, 512, %s47_s22, [#allocation7], %s4147_s29, %s4147_s29, %s4148_s30  }
  0x38   :  { %s4083_s0 = scalar_lea.vmem %s71_s24, 512  ;;  %p4088_p12 = scmp.lt.s32.totalorder %s71_s24, %s71_s24 }
  0x39   :  { %p4084_p11 = scmp.ne.s32.totalorder %s71_s24, %s4083_s0  ;;  %p4089_p13 = scmp.lt.s32.totalorder %s4083_s0, %s4083_s0 }
  0x3b   :  { %p4090_p0 = por %p4089_p13, %p4088_p12 }
  0x3d   :  { %p4091_p1 = pnand %p4090_p0, %p4084_p11 }
  0x3f   :  { %4094 = shalt.err (!%p4091_p1)
}
  0x40   :  { %76 = dma.hbm_to_vmem [thread:$0]  %s4614_s4, 512, %s71_s24, [#allocation10], %s4147_s29, %s4147_s29, %s4148_s30  }
  0x41   :  { %s4153_s8 = smov [#allocation14]  }
  0x42   :  { %s94_s9 = sshll.u32 %s4153_s8, 4  ;;  %s95_s9 = int_to_ptr.vmem [resolvable:$true] %s94_s9 }
  0x43   :  { %s4103_s10 = scalar_lea.vmem %s95_s9, 256  ;;  %p4108_p3 = scmp.lt.s32.totalorder %s95_s9, %s95_s9 }
  0x44   :  { %p4104_p2 = scmp.ne.s32.totalorder %s95_s9, %s4103_s10  ;;  %p4109_p4 = scmp.lt.s32.totalorder %s4103_s10, %s4103_s10 }
  0x46   :  { %p4110_p5 = por %p4109_p4, %p4108_p3 }
  0x48   :  { %p4111_p6 = pnand %p4110_p5, %p4104_p2 }
  0x4a   :  { %4114 = shalt.err (!%p4111_p6)
}
  0x4b   :  { %100 = dma.hbm_to_vmem [thread:$0]  %s4616_s6, 256, %s95_s9, [#allocation13], %s4147_s29, %s4147_s29, %s4148_s30  }
  0x4c   :  { %4135 = dma.done.wait [#allocation4], 256  }
  0x4d   :  { %4136 = vsyncadd [#allocation4], 4294967040 }
  0x4e   :  { %4137 = dma.done.wait [#allocation7], 768  }
  0x4f   :  { %4138 = vsyncadd [#allocation7], 4294966528 }
  0x50   :  { %4139 = dma.done.wait [#allocation10], 1024  }
  0x51   :  { %4140 = vsyncadd [#allocation10], 4294966272 }
  0x52   :  { %4141 = dma.done.wait [#allocation13], 768  }
  0x53   :  { %4142 = vsyncadd [#allocation13], 4294966528  ;;  %v131_v0 = vld [vmem:[#allocation8 + $0x18] sm:$0xff]  ;;  %v130_v2 = vld [vmem:[#allocation8 + $0x10] sm:$0xff]  ;;  %vm136_vm0 = vcmask 261120   ;;  %v4154_v12 = vmov 0.0   ;;  %v132_v13 = vlaneseq }
  0x54   :  { %v223_v1 = vld [vmem:[#allocation9 + $0x18] sm:$0xff]  ;;  %3662 = vmatprep.subr.mxu0 %v131_v0  ;;  %v222_v3 = vld [vmem:[#allocation9 + $0x10] sm:$0xff]  ;;  %v129_v4 = vld [vmem:[#allocation8 + $0x8] sm:$0xff]  ;;  %vm4155_vm1 = vmmov 0   ;;  %vm321_vm2 = vcmask 31744   ;;  %vm474_vm3 = vcmask 64512  }
  0x55   :  { %3673 = vmatprep.subr.mxu1 %v223_v1  ;;  %3663 = vmatpush3.msra.mxu0 %v131_v0  ;;  %v221_v5 = vld [vmem:[#allocation9 + $0x8] sm:$0xff]  ;;  %v128_v6 = vld [vmem:[#allocation8] sm:$0xff]  ;;  %v124_v8 = vld [vmem:[#allocation6] sm:$0xff]  ;;  %v4271_v14 = vshrl.u32 %v132_v13, 7  ;;  %s4156_s4 = smov 32   ;;  %s4157_s6 = smov 96  }
  0x56   :  { %3674 = vmatpush3.msra.mxu1 %v223_v1  ;;  %3664 = vmatprep.subr.mxu0 %v130_v2  ;;  %v220_v7 = vld [vmem:[#allocation9] sm:$0xff]  ;;  %v125_v10 = vld [vmem:[#allocation6 + $0x8] sm:$0xff]  ;;  %v127_v11 = vld [vmem:[#allocation3 + $0x8] sm:$0xff]  ;;  %s4158_s12 = smov 124   ;;  %s4159_s13 = smov 92  }
  0x57   :  { %3675 = vmatprep.subr.mxu1 %v222_v3  ;;  %3665 = vmatpush3.msra.mxu0 %v130_v2  ;;  %v126_v9 = vld [vmem:[#allocation3] sm:$0xff]  ;;  %v134_v15 = vsub.s32 0, %v4271_v14  ;;  %v307_v16 = vsub.s32 1, %v4271_v14  ;;  %v313_v48 = vsub.s32 2, %v4271_v14  ;;  %s4160_s14 = smov 120   ;;  %s4161_s15 = smov 88  }
  0x58   :  { %3676 = vmatpush3.msra.mxu1 %v222_v3  ;;  %3666 = vmatprep.subr.mxu0 %v129_v4  ;;  %v122_v17 = vld [vmem:[#allocation14] sm:$0xff]  ;;  %s4162_s16 = smov 116   ;;  %s4163_s1 = smov 84  }
  0x59   :  { %3677 = vmatprep.subr.mxu1 %v221_v5  ;;  %3667 = vmatpush3.msra.mxu0 %v129_v4  ;;  %v135_v18 = vrot.slane %v122_v17, %v134_v15  ;;  %v308_v19 = vrot.slane %v122_v17, %v307_v16  ;;  %v314_v49 = vrot.slane %v122_v17, %v313_v48  ;;  %s4164_s17 = smov 112   ;;  %s4165_s18 = smov 80  }
  0x5a   :  { %3678 = vmatpush3.msra.mxu1 %v221_v5  ;;  %3668 = vmatprep.subr.mxu0 %v128_v6  ;;  %s4166_s3 = smov 108   ;;  %s4167_s19 = smov 76  }
  0x5b   :  { %3679 = vmatprep.subr.mxu1 %v220_v7  ;;  %3669 = vmatpush3.msra.mxu0 %v128_v6  ;;  %s4168_s20 = smov 104   ;;  %s4169_s21 = smov 72  }
  0x5c   :  { %3670 = vmatprep.mubr.msk.f32.mxu0 %vm136_vm0, %v124_v8  ;;  %3680 = vmatpush3.msra.mxu1 %v220_v7  ;;  %s4170_s22 = smov 100   ;;  %s4171_s23 = smov 68  }
  0x5d   :  { %3681 = vmatprep.mubr.msk.f32.mxu1 %vm136_vm0, %v126_v9  ;;  %3671 = vmatmul.mubr.msk.f32.vlgmr.msra.gmra.mxu0 %vm136_vm0, %v125_v10  ;;  %s4172_s24 = smov 4   ;;  %s4173_s5 = smov 12  }
  0x5e   :  { %3682 = vmatmul.mubr.msk.f32.vlgmr.msra.gmra.mxu1 %vm136_vm0, %v127_v11  ;;  %3689 = vmatprep.subr.mxu1 %v4154_v12  ;;  %s4174_s25 = smov 16   ;;  %s4175_s26 = smov 20  }
  0x5f   :  { %3684 = vmatprep.subr.mxu0 %v4154_v12  ;;  %3691 = vmatprep.mubr.msk.f32.mxu1 %vm4155_vm1, %v4154_v12  ;;  %s4176_s0 = smov 24   ;;  %s4177_s27 = smov 28  }
  0x60   :  { %3686 = vmatprep.mubr.msk.f32.mxu0 %vm4155_vm1, %v4154_v12  ;;  %s4178_s28 = smov [#allocation15]  }
  0x61   :  { %s3502_s8 = sshll.u32 %s4178_s28, 4  ;;  %s3503_s8 = int_to_ptr.vmem [resolvable:$true] %s3502_s8 }
  0x62   :  { %s4115_s9 = scalar_lea.vmem %s3503_s8, 256  ;;  %p4120_p8 = scmp.lt.s32.totalorder %s3503_s8, %s3503_s8 }
  0x63   :  { %p4116_p7 = scmp.ne.s32.totalorder %s3503_s8, %s4115_s9  ;;  %p4121_p9 = scmp.lt.s32.totalorder %s4115_s9, %s4115_s9 }
  0x65   :  { %p4122_p10 = por %p4121_p9, %p4120_p8 }
  0x67   :  { %p4123_p11 = pnand %p4122_p10, %p4116_p7 }
 0x11d   :  { %v3672_v20 = vpop.f32.mrf.mxu0 }
 0x11e   :  { %v3683_v21 = vpop.f32.mrf.mxu1  ;;  %v215_v22 = vadd.f32 %v3672_v20, %v135_v18 }
 0x11f   :  { %v4275_v23 = vadd.f32 %v3683_v21, %v308_v19  ;;  %v209_v24 = vpop.f32.mrf.mxu0 }
 0x120   :  { %v296_v25 = vpop.f32.mrf.mxu1  ;;  %v4277_v26 = vmul.f32 0.17677669, %v215_v22  ;;  %v210_v27 = vadd.f32 %v209_v24, %v135_v18 }
 0x121   :  { %v4279_v28 = vadd.f32 %v308_v19, %v296_v25  ;;  %3690 = vmatpush3.xpose.msk.msra.mxu1 %vm321_vm2, %v4275_v23 }
 0x122   :  { %3699 = vmatprep.subr.mxu1 %v4154_v12  ;;  %v4284_v29 = vmul.f32 0.17677669, %v210_v27 }
 0x123   :  { %3685 = vmatpush3.xpose.msk.msra.mxu0 %vm321_vm2, %v4279_v28 }
 0x124   :  { %3692 = vmatmul.mubr.msk.f32.vlgmr.msra.gmra.mxu1 %vm321_vm2, %v4277_v26  ;;  %3694 = vmatprep.subr.mxu0 %v4154_v12 }
 0x125   :  { %3701 = vmatprep.mubr.msk.f32.mxu1 %vm4155_vm1, %v4154_v12 }
 0x126   :  { %3687 = vmatmul.mubr.msk.f32.vlgmr.msra.gmra.mxu0 %vm321_vm2, %v4284_v29 }
 0x127   :  { %3696 = vmatprep.mubr.msk.f32.mxu0 %vm4155_vm1, %v4154_v12 }
 0x1e4   :  { %v470_v30 = vpop.f32.mrf.mxu1 }
 0x1e5   :  { %v478_v35 = vsel %vm474_vm3, %v470_v30, -inf }
 0x1e6   :  { %v394_v31 = vpop.f32.mrf.mxu0  ;;  %v3693_v32 = vpop.f32.mrf.mxu1 }
 0x1e7   :  { %v475_v33 = vsel %vm474_vm3, %v394_v31, -inf }
 0x1e8   :  { %476 = vmax.xlane.f32.xlu0 %v475_v33  ;;  %v3688_v34 = vpop.f32.mrf.mxu0 }
 0x1ec   :  { %479 = vmax.xlane.f32.xlu0 %v478_v35 }
 0x271   :  { %v477_v36 = vpop.xlane.xlu0 %476 }
 0x272   :  { %vm481_vm4 = vcmp.ge.f32.partialorder %v394_v31, %v477_v36  ;;  %v503_v55 = vsub.f32 %v394_v31, %v477_v36 }
 0x273   :  { %v483_v37 = vsel %vm481_vm4, -1e+30, %v394_v31 }
 0x274   :  { %v485_v38 = vsel %vm474_vm3, %v483_v37, -inf  ;;  %v505_v57 = vmul.f32 1.442695, %v503_v55 }
 0x275   :  { %486 = vmax.xlane.f32.xlu1 %v485_v38  ;;  %v480_v39 = vpop.xlane.xlu0 %479 }
 0x276   :  { %vm482_vm5 = vcmp.ge.f32.partialorder %v470_v30, %v480_v39  ;;  %v504_v54 = vsub.f32 %v470_v30, %v480_v39 }
 0x277   :  { %v484_v40 = vsel %vm482_vm5, -1e+30, %v470_v30 }
 0x278   :  { %v488_v41 = vsel %vm474_vm3, %v484_v40, -inf  ;;  %v507_v56 = vmul.f32 1.442695, %v504_v54 }
 0x279   :  { %489 = vmax.xlane.f32.xlu1 %v488_v41 }
 0x27a   :  { %3900 = vpow2.f32 %v507_v56 }
 0x27b   :  { %3902 = vpow2.f32 %v505_v57 }
 0x287   :  { %v3901_v59 = vpop.eup %3900 }
 0x288   :  { %v3903_v61 = vpop.eup %3902 }
 0x2fe   :  { %v487_v42 = vpop.xlane.xlu1 %486 }
 0x2ff   :  { %vm491_vm6 = vcmp.ge.f32.partialorder %v483_v37, %v487_v42 }
 0x300   :  { %v493_v43 = vsel %vm491_vm6, -1e+30, %v483_v37 }
 0x301   :  { %v495_v44 = vsel %vm474_vm3, %v493_v43, -inf }
 0x302   :  { %496 = vmax.xlane.f32.xlu0 %v495_v44  ;;  %v490_v45 = vpop.xlane.xlu1 %489 }
 0x303   :  { %vm492_vm7 = vcmp.ge.f32.partialorder %v484_v40, %v490_v45 }
 0x304   :  { %v494_v46 = vsel %vm492_vm7, -1e+30, %v484_v40 }
 0x305   :  { %v498_v47 = vsel %vm474_vm3, %v494_v46, -inf }
 0x306   :  { %499 = vmax.xlane.f32.xlu1 %v498_v47 }
 0x318   :  { %316 = vrot.lane.b32.xlu0 %v314_v49, %s4156_s4 }
 0x38b   :  { %v497_v50 = vpop.xlane.xlu0 %496 }
 0x38c   :  { %vm501_vm9 = vcmp.ge.f32.partialorder %v394_v31, %v497_v50 }
 0x38d   :  { %v509_v63 = vsel %vm501_vm9, %v3903_v61, 0.0 }
 0x38e   :  { %v511_v0 = vsel %vm474_vm3, %v509_v63, 0.0 }
 0x38f   :  { %v317_v51 = vpop.permute.xlu0 %316  ;;  %v500_v58 = vpop.xlane.xlu1 %499 }
 0x390   :  { %v4304_v52 = vadd.f32 %v317_v51, %v296_v25  ;;  %v4306_v53 = vadd.f32 %v3683_v21, %v317_v51  ;;  %vm502_vm8 = vcmp.ge.f32.partialorder %v470_v30, %v500_v58 }
 0x391   :  { %v510_v60 = vsel %vm502_vm8, %v3901_v59, 0.0 }
 0x392   :  { %599 = vrot.lane.b32.xlu0 %v4306_v53, %s4157_s6  ;;  %522 = vrot.lane.b32.xlu1 %v4304_v52, %s4157_s6  ;;  %v514_v62 = vsel %vm474_vm3, %v510_v60, 0.0 }
 0x396   :  { %757 = vrot.lane.b32.xlu0 %v4275_v23, %s4158_s12  ;;  %679 = vrot.lane.b32.xlu1 %v4279_v28, %s4158_s12 }
 0x39a   :  { %755 = vrot.lane.b32.xlu0 %v4277_v26, %s4158_s12 }
 0x3ba   :  { %515 = vadd.xlane.f32.xlu1 %v514_v62 }
 0x3be   :  { %512 = vadd.xlane.f32.xlu1 %v511_v0 }
 0x3cf   :  { %677 = vrot.lane.b32.xlu1 %v4284_v29, %s4158_s12 }
 0x404   :  { %v600_v1 = vpop.permute.xlu0 %599  ;;  %v523_v2 = vpop.permute.xlu1 %522 }
 0x405   :  { %3695 = vmatpush3.msra.mxu0 %v523_v2  ;;  %3700 = vmatpush3.msra.mxu1 %v600_v1 }
 0x406   :  { %3709 = vmatprep.subr.mxu1 %v4154_v12  ;;  %3704 = vmatprep.subr.mxu0 %v4154_v12 }
 0x408   :  { %v680_v3 = vpop.permute.xlu1 %679  ;;  %v758_v7 = vpop.permute.xlu0 %757 }
 0x40c   :  { %v756_v11 = vpop.permute.xlu0 %755 }
 0x443   :  { %v516_v4 = vpop.xlane.xlu1 %515 }
 0x444   :  { %3904 = vrcp.f32 %v516_v4 }
 0x447   :  { %v513_v5 = vpop.xlane.xlu1 %512 }
 0x448   :  { %3906 = vrcp.f32 %v513_v5 }
 0x44b   :  { %v678_v13 = vpop.permute.xlu1 %677 }
 0x451   :  { %v3905_v6 = vpop.eup %3904 }
 0x452   :  { %v520_v8 = vmul.f32 %v3905_v6, %v510_v60 }
 0x454   :  { %3702 = vmatmul.mubr.msk.f32.vlgmr.msra.gmra.mxu1 %vm474_vm3, %v520_v8 }
 0x455   :  { %v3907_v9 = vpop.eup %3906  ;;  %3710 = vmatpush3.xpose.msk.msra.mxu1 %vm321_vm2, %v758_v7  ;;  %3711 = vmatprep.mubr.msk.f32.mxu1 %vm4155_vm1, %v4154_v12 }
 0x456   :  { %v519_v10 = vmul.f32 %v3907_v9, %v509_v63  ;;  %3719 = vmatprep.subr.mxu1 %v4154_v12 }
 0x458   :  { %3697 = vmatmul.mubr.msk.f32.vlgmr.msra.gmra.mxu0 %vm474_vm3, %v519_v10  ;;  %3712 = vmatmul.mubr.msk.f32.vlgmr.msra.gmra.mxu1 %vm321_vm2, %v756_v11 }
 0x459   :  { %3705 = vmatpush3.xpose.msk.msra.mxu0 %vm321_vm2, %v680_v3  ;;  %3706 = vmatprep.mubr.msk.f32.mxu0 %vm4155_vm1, %v4154_v12 }
 0x45a   :  { %3714 = vmatprep.subr.mxu0 %v4154_v12  ;;  %3721 = vmatprep.mubr.msk.f32.mxu1 %vm4155_vm1, %v4154_v12 }
 0x45c   :  { %3707 = vmatmul.mubr.msk.f32.vlgmr.msra.gmra.mxu0 %vm321_vm2, %v678_v13 }
 0x45d   :  { %3716 = vmatprep.mubr.msk.f32.mxu0 %vm4155_vm1, %v4154_v12 }
 0x514   :  { %v671_v15 = vpop.f32.mrf.mxu1 }
 0x515   :  { %676 = vst.msk [vmem:[#allocation2 + $0x8] sm:$0xff] %vm321_vm2, %v671_v15 }
 0x516   :  { %v3703_v16 = vpop.f32.mrf.mxu1 }
 0x518   :  { %v594_v17 = vpop.f32.mrf.mxu0  ;;  %v829_v18 = vpop.f32.mrf.mxu1 }
 0x519   :  { %675 = vst.msk [vmem:[#allocation2] sm:$0xff] %vm321_vm2, %v594_v17  ;;  %v836_v19 = vsel %vm474_vm3, %v829_v18, -inf }
 0x51a   :  { %837 = vmax.xlane.f32.xlu0 %v836_v19  ;;  %v3698_v20 = vpop.f32.mrf.mxu0  ;;  %v3713_v21 = vpop.f32.mrf.mxu1 }
 0x51c   :  { %v751_v22 = vpop.f32.mrf.mxu0 }
 0x51d   :  { %v833_v24 = vsel %vm474_vm3, %v751_v22, -inf }
 0x51e   :  { %834 = vmax.xlane.f32.xlu1 %v833_v24  ;;  %v3708_v25 = vpop.f32.mrf.mxu0 }
 0x5a3   :  { %v838_v27 = vpop.xlane.xlu0 %837 }
 0x5a4   :  { %vm840_vm10 = vcmp.ge.f32.partialorder %v829_v18, %v838_v27  ;;  %v862_v42 = vsub.f32 %v829_v18, %v838_v27 }
 0x5a5   :  { %v842_v33 = vsel %vm840_vm10, -1e+30, %v829_v18 }
 0x5a6   :  { %v846_v34 = vsel %vm474_vm3, %v842_v33, -inf  ;;  %v865_v44 = vmul.f32 1.442695, %v862_v42 }
 0x5a7   :  { %v835_v30 = vpop.xlane.xlu1 %834 }
 0x5a8   :  { %vm839_vm11 = vcmp.ge.f32.partialorder %v751_v22, %v835_v30  ;;  %v861_v41 = vsub.f32 %v751_v22, %v835_v30 }
 0x5a9   :  { %v841_v31 = vsel %vm839_vm11, -1e+30, %v751_v22 }
 0x5aa   :  { %v843_v32 = vsel %vm474_vm3, %v841_v31, -inf  ;;  %v863_v43 = vmul.f32 1.442695, %v861_v41 }
 0x5ab   :  { %844 = vmax.xlane.f32.xlu0 %v843_v32 }
 0x5ac   :  { %3908 = vpow2.f32 %v863_v43 }
 0x5ad   :  { %3910 = vpow2.f32 %v865_v44 }
 0x5af   :  { %847 = vmax.xlane.f32.xlu0 %v846_v34 }
 0x5b9   :  { %v3909_v46 = vpop.eup %3908 }
 0x5ba   :  { %v3911_v51 = vpop.eup %3910 }
 0x634   :  { %v845_v35 = vpop.xlane.xlu0 %844 }
 0x635   :  { %vm849_vm12 = vcmp.ge.f32.partialorder %v841_v31, %v845_v35 }
 0x636   :  { %v851_v36 = vsel %vm849_vm12, -1e+30, %v841_v31 }
 0x637   :  { %v853_v37 = vsel %vm474_vm3, %v851_v36, -inf }
 0x638   :  { %854 = vmax.xlane.f32.xlu1 %v853_v37  ;;  %v848_v38 = vpop.xlane.xlu0 %847 }
 0x639   :  { %vm850_vm13 = vcmp.ge.f32.partialorder %v842_v33, %v848_v38 }
 0x63a   :  { %v852_v39 = vsel %vm850_vm13, -1e+30, %v842_v33 }
 0x63b   :  { %v856_v40 = vsel %vm474_vm3, %v852_v39, -inf }
 0x63c   :  { %857 = vmax.xlane.f32.xlu0 %v856_v40 }
 0x649   :  { %879 = vrot.lane.b32.xlu1 %v4304_v52, %s4159_s13 }
 0x64d   :  { %1044 = vrot.lane.b32.xlu1 %v4279_v28, %s4160_s14 }
 0x651   :  { %1122 = vrot.lane.b32.xlu1 %v4275_v23, %s4160_s14 }
 0x6c1   :  { %v855_v45 = vpop.xlane.xlu1 %854 }
 0x6c2   :  { %vm859_vm14 = vcmp.ge.f32.partialorder %v751_v22, %v855_v45 }
 0x6c3   :  { %v867_v47 = vsel %vm859_vm14, %v3909_v46, 0.0 }
 0x6c4   :  { %v869_v48 = vsel %vm474_vm3, %v867_v47, 0.0 }
 0x6c5   :  { %870 = vadd.xlane.f32.xlu1 %v869_v48  ;;  %v880_v49 = vpop.permute.xlu1 %879  ;;  %v858_v50 = vpop.xlane.xlu0 %857 }
 0x6c6   :  { %vm860_vm15 = vcmp.ge.f32.partialorder %v829_v18, %v858_v50  ;;  %3715 = vmatpush3.msra.mxu0 %v880_v49 }
 0x6c7   :  { %v868_v54 = vsel %vm860_vm15, %v3911_v51, 0.0  ;;  %3724 = vmatprep.subr.mxu0 %v4154_v12 }
 0x6c8   :  { %v872_v55 = vsel %vm474_vm3, %v868_v54, 0.0 }
 0x6c9   :  { %873 = vadd.xlane.f32.xlu0 %v872_v55  ;;  %v1045_v56 = vpop.permute.xlu1 %1044 }
 0x6cd   :  { %v1123_v57 = vpop.permute.xlu1 %1122 }
 0x6d6   :  { %1042 = vrot.lane.b32.xlu1 %v4284_v29, %s4160_s14 }
 0x6df   :  { %955 = vrot.lane.b32.xlu0 %v4306_v53, %s4159_s13 }
 0x6e3   :  { %1120 = vrot.lane.b32.xlu0 %v4277_v26, %s4160_s14 }
 0x74e   :  { %v871_v58 = vpop.xlane.xlu1 %870 }
 0x74f   :  { %3912 = vrcp.f32 %v871_v58 }
 0x752   :  { %v874_v59 = vpop.xlane.xlu0 %873  ;;  %v1043_v1 = vpop.permute.xlu1 %1042 }
 0x753   :  { %3914 = vrcp.f32 %v874_v59 }
 0x756   :  { %v956_v60 = vpop.permute.xlu0 %955 }
 0x757   :  { %3720 = vmatpush3.msra.mxu1 %v956_v60 }
 0x758   :  { %3729 = vmatprep.subr.mxu1 %v4154_v12 }
 0x75a   :  { %v1121_v2 = vpop.permute.xlu0 %1120 }
 0x75c   :  { %v3913_v61 = vpop.eup %3912 }
 0x75d   :  { %v877_v62 = vmul.f32 %v3913_v61, %v867_v47 }
 0x75f   :  { %3717 = vmatmul.mubr.msk.f32.vlgmr.msra.gmra.mxu0 %vm474_vm3, %v877_v62 }
 0x760   :  { %v3915_v63 = vpop.eup %3914  ;;  %3725 = vmatpush3.xpose.msk.msra.mxu0 %vm321_vm2, %v1045_v56  ;;  %3726 = vmatprep.mubr.msk.f32.mxu0 %vm4155_vm1, %v4154_v12 }
 0x761   :  { %v878_v0 = vmul.f32 %v3915_v63, %v868_v54  ;;  %3734 = vmatprep.subr.mxu0 %v4154_v12 }
 0x763   :  { %3722 = vmatmul.mubr.msk.f32.vlgmr.msra.gmra.mxu1 %vm474_vm3, %v878_v0  ;;  %3727 = vmatmul.mubr.msk.f32.vlgmr.msra.gmra.mxu0 %vm321_vm2, %v1043_v1 }
 0x764   :  { %3730 = vmatpush3.xpose.msk.msra.mxu1 %vm321_vm2, %v1123_v57  ;;  %3731 = vmatprep.mubr.msk.f32.mxu1 %vm4155_vm1, %v4154_v12 }
 0x765   :  { %3739 = vmatprep.subr.mxu1 %v4154_v12  ;;  %3736 = vmatprep.mubr.msk.f32.mxu0 %vm4155_vm1, %v4154_v12 }
 0x767   :  { %3732 = vmatmul.mubr.msk.f32.vlgmr.msra.gmra.mxu1 %vm321_vm2, %v1121_v2 }
 0x768   :  { %3741 = vmatprep.mubr.msk.f32.mxu1 %vm4155_vm1, %v4154_v12 }
 0x81f   :  { %v4368_v3 = vpop.f32.mrf.mxu0 }
 0x821   :  { %v3718_v4 = vpop.f32.mrf.mxu0 }
 0x823   :  { %v4370_v5 = vpop.f32.mrf.mxu1  ;;  %v1116_v6 = vpop.f32.mrf.mxu0 }
 0x824   :  { %v1198_v7 = vsel %vm474_vm3, %v1116_v6, -inf }
 0x825   :  { %v3723_v8 = vpop.f32.mrf.mxu1  ;;  %1199 = vmax.xlane.f32.xlu1 %v1198_v7  ;;  %v3728_v9 = vpop.f32.mrf.mxu0 }
 0x827   :  { %v1194_v10 = vpop.f32.mrf.mxu1 }
 0x828   :  { %v1201_v11 = vsel %vm474_vm3, %v1194_v10, -inf }
 0x829   :  { %1202 = vmax.xlane.f32.xlu0 %v1201_v11  ;;  %v3733_v13 = vpop.f32.mrf.mxu1 }
 0x8ae   :  { %v1200_v15 = vpop.xlane.xlu1 %1199 }
 0x8af   :  { %vm1204_vm4 = vcmp.ge.f32.partialorder %v1116_v6, %v1200_v15  ;;  %v1226_v31 = vsub.f32 %v1116_v6, %v1200_v15 }
 0x8b0   :  { %v1206_v16 = vsel %vm1204_vm4, -1e+30, %v1116_v6 }
 0x8b1   :  { %v1208_v17 = vsel %vm474_vm3, %v1206_v16, -inf  ;;  %v1228_v32 = vmul.f32 1.442695, %v1226_v31 }
 0x8b2   :  { %v1203_v18 = vpop.xlane.xlu0 %1202  ;;  %1209 = vmax.xlane.f32.xlu0 %v1208_v17 }
 0x8b3   :  { %vm1205_vm5 = vcmp.ge.f32.partialorder %v1194_v10, %v1203_v18  ;;  %v1227_v33 = vsub.f32 %v1194_v10, %v1203_v18  ;;  %3916 = vpow2.f32 %v1228_v32 }
 0x8b4   :  { %v1207_v19 = vsel %vm1205_vm5, -1e+30, %v1194_v10 }
 0x8b5   :  { %v1211_v20 = vsel %vm474_vm3, %v1207_v19, -inf  ;;  %v1230_v34 = vmul.f32 1.442695, %v1227_v33 }
 0x8b6   :  { %1212 = vmax.xlane.f32.xlu0 %v1211_v20 }
 0x8b7   :  { %3918 = vpow2.f32 %v1230_v34 }
 0x8c0   :  { %v3917_v36 = vpop.eup %3916 }
 0x8c4   :  { %v3919_v41 = vpop.eup %3918 }
 0x93b   :  { %v1210_v21 = vpop.xlane.xlu0 %1209 }
 0x93c   :  { %vm1214_vm6 = vcmp.ge.f32.partialorder %v1206_v16, %v1210_v21 }
 0x93d   :  { %v1216_v22 = vsel %vm1214_vm6, -1e+30, %v1206_v16 }
 0x93e   :  { %v1218_v24 = vsel %vm474_vm3, %v1216_v22, -inf }
 0x93f   :  { %1219 = vmax.xlane.f32.xlu1 %v1218_v24  ;;  %v1213_v25 = vpop.xlane.xlu0 %1212 }
 0x940   :  { %vm1215_vm7 = vcmp.ge.f32.partialorder %v1207_v19, %v1213_v25 }
 0x941   :  { %v1217_v27 = vsel %vm1215_vm7, -1e+30, %v1207_v19 }
 0x942   :  { %v1221_v30 = vsel %vm474_vm3, %v1217_v27, -inf }
 0x943   :  { %1222 = vmax.xlane.f32.xlu0 %v1221_v30 }
 0x950   :  { %1244 = vrot.lane.b32.xlu1 %v4304_v52, %s4161_s15 }
 0x954   :  { %1409 = vrot.lane.b32.xlu1 %v4279_v28, %s4162_s16 }
 0x958   :  { %1487 = vrot.lane.b32.xlu1 %v4275_v23, %s4162_s16 }
 0x9c8   :  { %v1220_v35 = vpop.xlane.xlu1 %1219 }
 0x9c9   :  { %vm1224_vm8 = vcmp.ge.f32.partialorder %v1116_v6, %v1220_v35 }
 0x9ca   :  { %v1232_v37 = vsel %vm1224_vm8, %v3917_v36, 0.0 }
 0x9cb   :  { %v1234_v38 = vsel %vm474_vm3, %v1232_v37, 0.0 }
 0x9cc   :  { %1235 = vadd.xlane.f32.xlu1 %v1234_v38  ;;  %v1245_v39 = vpop.permute.xlu1 %1244  ;;  %v1223_v40 = vpop.xlane.xlu0 %1222 }
 0x9cd   :  { %vm1225_vm9 = vcmp.ge.f32.partialorder %v1194_v10, %v1223_v40  ;;  %3735 = vmatpush3.msra.mxu0 %v1245_v39 }
 0x9ce   :  { %v1233_v42 = vsel %vm1225_vm9, %v3919_v41, 0.0  ;;  %3744 = vmatprep.subr.mxu0 %v4154_v12 }
 0x9cf   :  { %v1237_v43 = vsel %vm474_vm3, %v1233_v42, 0.0 }
 0x9d0   :  { %1238 = vadd.xlane.f32.xlu0 %v1237_v43  ;;  %v1410_v44 = vpop.permute.xlu1 %1409 }
 0x9d4   :  { %v1488_v45 = vpop.permute.xlu1 %1487 }
 0x9dd   :  { %1407 = vrot.lane.b32.xlu1 %v4284_v29, %s4162_s16 }
 0x9e6   :  { %1320 = vrot.lane.b32.xlu0 %v4306_v53, %s4161_s15 }
 0x9ea   :  { %1485 = vrot.lane.b32.xlu0 %v4277_v26, %s4162_s16 }
 0xa55   :  { %v1236_v46 = vpop.xlane.xlu1 %1235 }
 0xa56   :  { %3920 = vrcp.f32 %v1236_v46 }
 0xa59   :  { %v1239_v47 = vpop.xlane.xlu0 %1238  ;;  %v1408_v55 = vpop.permute.xlu1 %1407 }
 0xa5a   :  { %3922 = vrcp.f32 %v1239_v47 }
 0xa5d   :  { %v1321_v48 = vpop.permute.xlu0 %1320 }
 0xa5e   :  { %3740 = vmatpush3.msra.mxu1 %v1321_v48 }
 0xa5f   :  { %3749 = vmatprep.subr.mxu1 %v4154_v12 }
 0xa61   :  { %v1486_v56 = vpop.permute.xlu0 %1485 }
 0xa63   :  { %v3921_v49 = vpop.eup %3920 }
 0xa64   :  { %v1242_v50 = vmul.f32 %v3921_v49, %v1232_v37 }
 0xa66   :  { %3737 = vmatmul.mubr.msk.f32.vlgmr.msra.gmra.mxu0 %vm474_vm3, %v1242_v50 }
 0xa67   :  { %v3923_v51 = vpop.eup %3922  ;;  %3745 = vmatpush3.xpose.msk.msra.mxu0 %vm321_vm2, %v1410_v44  ;;  %3746 = vmatprep.mubr.msk.f32.mxu0 %vm4155_vm1, %v4154_v12 }
 0xa68   :  { %v1243_v54 = vmul.f32 %v3923_v51, %v1233_v42  ;;  %3754 = vmatprep.subr.mxu0 %v4154_v12 }
 0xa6a   :  { %3742 = vmatmul.mubr.msk.f32.vlgmr.msra.gmra.mxu1 %vm474_vm3, %v1243_v54  ;;  %3747 = vmatmul.mubr.msk.f32.vlgmr.msra.gmra.mxu0 %vm321_vm2, %v1408_v55 }
 0xa6b   :  { %3750 = vmatpush3.xpose.msk.msra.mxu1 %vm321_vm2, %v1488_v45  ;;  %3751 = vmatprep.mubr.msk.f32.mxu1 %vm4155_vm1, %v4154_v12 }
 0xa6c   :  { %3759 = vmatprep.subr.mxu1 %v4154_v12  ;;  %3756 = vmatprep.mubr.msk.f32.mxu0 %vm4155_vm1, %v4154_v12 }
 0xa6e   :  { %3752 = vmatmul.mubr.msk.f32.vlgmr.msra.gmra.mxu1 %vm321_vm2, %v1486_v56 }
 0xa6f   :  { %3761 = vmatprep.mubr.msk.f32.mxu1 %vm4155_vm1, %v4154_v12 }
 0xb26   :  { %v4404_v57 = vpop.f32.mrf.mxu0 }
 0xb28   :  { %v3738_v58 = vpop.f32.mrf.mxu0 }
 0xb2a   :  { %v4406_v59 = vpop.f32.mrf.mxu1  ;;  %v1481_v60 = vpop.f32.mrf.mxu0 }
 0xb2b   :  { %v1563_v61 = vsel %vm474_vm3, %v1481_v60, -inf }
 0xb2c   :  { %v3743_v62 = vpop.f32.mrf.mxu1  ;;  %1564 = vmax.xlane.f32.xlu1 %v1563_v61  ;;  %v3748_v63 = vpop.f32.mrf.mxu0 }
 0xb2e   :  { %v1559_v0 = vpop.f32.mrf.mxu1 }
 0xb2f   :  { %v1566_v1 = vsel %vm474_vm3, %v1559_v0, -inf }
 0xb30   :  { %1567 = vmax.xlane.f32.xlu0 %v1566_v1  ;;  %v3753_v2 = vpop.f32.mrf.mxu1 }
 0xbb5   :  { %v1565_v4 = vpop.xlane.xlu1 %1564 }
 0xbb6   :  { %vm1569_vm10 = vcmp.ge.f32.partialorder %v1481_v60, %v1565_v4  ;;  %v1591_v19 = vsub.f32 %v1481_v60, %v1565_v4 }
 0xbb7   :  { %v1571_v6 = vsel %vm1569_vm10, -1e+30, %v1481_v60 }
 0xbb8   :  { %v1573_v7 = vsel %vm474_vm3, %v1571_v6, -inf  ;;  %v1593_v20 = vmul.f32 1.442695, %v1591_v19 }
 0xbb9   :  { %v1568_v8 = vpop.xlane.xlu0 %1567  ;;  %1574 = vmax.xlane.f32.xlu0 %v1573_v7 }
 0xbba   :  { %vm1570_vm11 = vcmp.ge.f32.partialorder %v1559_v0, %v1568_v8  ;;  %v1592_v21 = vsub.f32 %v1559_v0, %v1568_v8  ;;  %3924 = vpow2.f32 %v1593_v20 }
 0xbbb   :  { %v1572_v9 = vsel %vm1570_vm11, -1e+30, %v1559_v0 }
 0xbbc   :  { %v1576_v10 = vsel %vm474_vm3, %v1572_v9, -inf  ;;  %v1595_v22 = vmul.f32 1.442695, %v1592_v21 }
 0xbbd   :  { %1577 = vmax.xlane.f32.xlu0 %v1576_v10 }
 0xbbe   :  { %3926 = vpow2.f32 %v1595_v22 }
 0xbc7   :  { %v3925_v25 = vpop.eup %3924 }
 0xbcb   :  { %v3927_v33 = vpop.eup %3926 }
 0xc42   :  { %v1575_v11 = vpop.xlane.xlu0 %1574 }
 0xc43   :  { %vm1579_vm12 = vcmp.ge.f32.partialorder %v1571_v6, %v1575_v11 }
 0xc44   :  { %v1581_v13 = vsel %vm1579_vm12, -1e+30, %v1571_v6 }
 0xc45   :  { %v1583_v15 = vsel %vm474_vm3, %v1581_v13, -inf }
 0xc46   :  { %1584 = vmax.xlane.f32.xlu1 %v1583_v15  ;;  %v1578_v16 = vpop.xlane.xlu0 %1577 }
 0xc47   :  { %vm1580_vm13 = vcmp.ge.f32.partialorder %v1572_v9, %v1578_v16 }
 0xc48   :  { %v1582_v17 = vsel %vm1580_vm13, -1e+30, %v1572_v9 }
 0xc49   :  { %v1586_v18 = vsel %vm474_vm3, %v1582_v17, -inf }
 0xc4a   :  { %1587 = vmax.xlane.f32.xlu0 %v1586_v18 }
 0xc57   :  { %1609 = vrot.lane.b32.xlu1 %v4304_v52, %s4163_s1 }
 0xc5b   :  { %1774 = vrot.lane.b32.xlu1 %v4279_v28, %s4164_s17 }
 0xc5f   :  { %1852 = vrot.lane.b32.xlu1 %v4275_v23, %s4164_s17 }
 0xccf   :  { %v1585_v24 = vpop.xlane.xlu1 %1584 }
 0xcd0   :  { %vm1589_vm14 = vcmp.ge.f32.partialorder %v1481_v60, %v1585_v24 }
 0xcd1   :  { %v1597_v27 = vsel %vm1589_vm14, %v3925_v25, 0.0 }
 0xcd2   :  { %v1599_v30 = vsel %vm474_vm3, %v1597_v27, 0.0 }
 0xcd3   :  { %1600 = vadd.xlane.f32.xlu1 %v1599_v30  ;;  %v1610_v31 = vpop.permute.xlu1 %1609  ;;  %v1588_v32 = vpop.xlane.xlu0 %1587 }
 0xcd4   :  { %vm1590_vm15 = vcmp.ge.f32.partialorder %v1559_v0, %v1588_v32  ;;  %3755 = vmatpush3.msra.mxu0 %v1610_v31 }
 0xcd5   :  { %v1598_v34 = vsel %vm1590_vm15, %v3927_v33, 0.0  ;;  %3764 = vmatprep.subr.mxu0 %v4154_v12 }
 0xcd6   :  { %v1602_v35 = vsel %vm474_vm3, %v1598_v34, 0.0 }
 0xcd7   :  { %1603 = vadd.xlane.f32.xlu0 %v1602_v35  ;;  %v1775_v36 = vpop.permute.xlu1 %1774 }
 0xcdb   :  { %v1853_v37 = vpop.permute.xlu1 %1852 }
 0xce4   :  { %1772 = vrot.lane.b32.xlu1 %v4284_v29, %s4164_s17 }
 0xced   :  { %1685 = vrot.lane.b32.xlu0 %v4306_v53, %s4163_s1 }
 0xcf1   :  { %1850 = vrot.lane.b32.xlu0 %v4277_v26, %s4164_s17 }
 0xd5c   :  { %v1601_v38 = vpop.xlane.xlu1 %1600 }
 0xd5d   :  { %3928 = vrcp.f32 %v1601_v38 }
 0xd60   :  { %v1604_v39 = vpop.xlane.xlu0 %1603  ;;  %v1773_v45 = vpop.permute.xlu1 %1772 }
 0xd61   :  { %3930 = vrcp.f32 %v1604_v39 }
 0xd64   :  { %v1686_v40 = vpop.permute.xlu0 %1685 }
 0xd65   :  { %3760 = vmatpush3.msra.mxu1 %v1686_v40 }
 0xd66   :  { %3769 = vmatprep.subr.mxu1 %v4154_v12 }
 0xd68   :  { %v1851_v46 = vpop.permute.xlu0 %1850 }
 0xd6a   :  { %v3929_v41 = vpop.eup %3928 }
 0xd6b   :  { %v1607_v42 = vmul.f32 %v3929_v41, %v1597_v27 }
 0xd6d   :  { %3757 = vmatmul.mubr.msk.f32.vlgmr.msra.gmra.mxu0 %vm474_vm3, %v1607_v42 }
 0xd6e   :  { %v3931_v43 = vpop.eup %3930  ;;  %3765 = vmatpush3.xpose.msk.msra.mxu0 %vm321_vm2, %v1775_v36  ;;  %3766 = vmatprep.mubr.msk.f32.mxu0 %vm4155_vm1, %v4154_v12 }
 0xd6f   :  { %v1608_v44 = vmul.f32 %v3931_v43, %v1598_v34  ;;  %3774 = vmatprep.subr.mxu0 %v4154_v12 }
 0xd71   :  { %3762 = vmatmul.mubr.msk.f32.vlgmr.msra.gmra.mxu1 %vm474_vm3, %v1608_v44  ;;  %3767 = vmatmul.mubr.msk.f32.vlgmr.msra.gmra.mxu0 %vm321_vm2, %v1773_v45 }
 0xd72   :  { %3770 = vmatpush3.xpose.msk.msra.mxu1 %vm321_vm2, %v1853_v37  ;;  %3771 = vmatprep.mubr.msk.f32.mxu1 %vm4155_vm1, %v4154_v12 }
 0xd73   :  { %3779 = vmatprep.subr.mxu1 %v4154_v12  ;;  %3776 = vmatprep.mubr.msk.f32.mxu0 %vm4155_vm1, %v4154_v12 }
 0xd75   :  { %3772 = vmatmul.mubr.msk.f32.vlgmr.msra.gmra.mxu1 %vm321_vm2, %v1851_v46 }
 0xd76   :  { %3781 = vmatprep.mubr.msk.f32.mxu1 %vm4155_vm1, %v4154_v12 }
 0xe2d   :  { %v4440_v47 = vpop.f32.mrf.mxu0 }
 0xe2f   :  { %v3758_v48 = vpop.f32.mrf.mxu0 }
 0xe31   :  { %v4442_v49 = vpop.f32.mrf.mxu1  ;;  %v1846_v50 = vpop.f32.mrf.mxu0 }
 0xe32   :  { %v1928_v51 = vsel %vm474_vm3, %v1846_v50, -inf }
 0xe33   :  { %v3763_v54 = vpop.f32.mrf.mxu1  ;;  %1929 = vmax.xlane.f32.xlu1 %v1928_v51  ;;  %v3768_v55 = vpop.f32.mrf.mxu0 }
 0xe35   :  { %v1924_v56 = vpop.f32.mrf.mxu1 }
 0xe36   :  { %v1931_v58 = vsel %vm474_vm3, %v1924_v56, -inf }
 0xe37   :  { %1932 = vmax.xlane.f32.xlu0 %v1931_v58  ;;  %v3773_v60 = vpop.f32.mrf.mxu1 }
 0xebc   :  { %v1930_v61 = vpop.xlane.xlu1 %1929 }
 0xebd   :  { %vm1934_vm4 = vcmp.ge.f32.partialorder %v1846_v50, %v1930_v61  ;;  %v1956_v11 = vsub.f32 %v1846_v50, %v1930_v61 }
 0xebe   :  { %v1936_v62 = vsel %vm1934_vm4, -1e+30, %v1846_v50 }
 0xebf   :  { %v1938_v63 = vsel %vm474_vm3, %v1936_v62, -inf  ;;  %v1958_v13 = vmul.f32 1.442695, %v1956_v11 }
 0xec0   :  { %v1933_v0 = vpop.xlane.xlu0 %1932  ;;  %1939 = vmax.xlane.f32.xlu0 %v1938_v63 }
 0xec1   :  { %vm1935_vm5 = vcmp.ge.f32.partialorder %v1924_v56, %v1933_v0  ;;  %v1957_v15 = vsub.f32 %v1924_v56, %v1933_v0  ;;  %3932 = vpow2.f32 %v1958_v13 }
 0xec2   :  { %v1937_v1 = vsel %vm1935_vm5, -1e+30, %v1924_v56 }
 0xec3   :  { %v1941_v2 = vsel %vm474_vm3, %v1937_v1, -inf  ;;  %v1960_v16 = vmul.f32 1.442695, %v1957_v15 }
 0xec4   :  { %1942 = vmax.xlane.f32.xlu0 %v1941_v2 }
 0xec5   :  { %3934 = vpow2.f32 %v1960_v16 }
 0xece   :  { %v3933_v18 = vpop.eup %3932 }
 0xed2   :  { %v3935_v24 = vpop.eup %3934 }
 0xf49   :  { %v1940_v4 = vpop.xlane.xlu0 %1939 }
 0xf4a   :  { %vm1944_vm6 = vcmp.ge.f32.partialorder %v1936_v62, %v1940_v4 }
 0xf4b   :  { %v1946_v6 = vsel %vm1944_vm6, -1e+30, %v1936_v62 }
 0xf4c   :  { %v1948_v7 = vsel %vm474_vm3, %v1946_v6, -inf }
 0xf4d   :  { %1949 = vmax.xlane.f32.xlu1 %v1948_v7  ;;  %v1943_v8 = vpop.xlane.xlu0 %1942 }
 0xf4e   :  { %vm1945_vm7 = vcmp.ge.f32.partialorder %v1937_v1, %v1943_v8 }
 0xf4f   :  { %v1947_v9 = vsel %vm1945_vm7, -1e+30, %v1937_v1 }
 0xf50   :  { %v1951_v10 = vsel %vm474_vm3, %v1947_v9, -inf }
 0xf51   :  { %1952 = vmax.xlane.f32.xlu0 %v1951_v10 }
 0xf5e   :  { %1974 = vrot.lane.b32.xlu1 %v4304_v52, %s4165_s18 }
 0xf62   :  { %2139 = vrot.lane.b32.xlu1 %v4279_v28, %s4166_s3 }
 0xf66   :  { %2217 = vrot.lane.b32.xlu1 %v4275_v23, %s4166_s3 }
 0xfd6   :  { %v1950_v17 = vpop.xlane.xlu1 %1949 }
 0xfd7   :  { %vm1954_vm8 = vcmp.ge.f32.partialorder %v1846_v50, %v1950_v17 }
 0xfd8   :  { %v1962_v19 = vsel %vm1954_vm8, %v3933_v18, 0.0 }
 0xfd9   :  { %v1964_v20 = vsel %vm474_vm3, %v1962_v19, 0.0 }
 0xfda   :  { %1965 = vadd.xlane.f32.xlu1 %v1964_v20  ;;  %v1975_v21 = vpop.permute.xlu1 %1974  ;;  %v1953_v22 = vpop.xlane.xlu0 %1952 }
 0xfdb   :  { %vm1955_vm9 = vcmp.ge.f32.partialorder %v1924_v56, %v1953_v22  ;;  %3775 = vmatpush3.msra.mxu0 %v1975_v21 }
 0xfdc   :  { %v1963_v25 = vsel %vm1955_vm9, %v3935_v24, 0.0  ;;  %3784 = vmatprep.subr.mxu0 %v4154_v12 }
 0xfdd   :  { %v1967_v27 = vsel %vm474_vm3, %v1963_v25, 0.0 }
 0xfde   :  { %1968 = vadd.xlane.f32.xlu0 %v1967_v27  ;;  %v2140_v30 = vpop.permute.xlu1 %2139 }
 0xfe2   :  { %v2218_v31 = vpop.permute.xlu1 %2217 }
 0xfeb   :  { %2137 = vrot.lane.b32.xlu1 %v4284_v29, %s4166_s3 }
 0xff4   :  { %2050 = vrot.lane.b32.xlu0 %v4306_v53, %s4165_s18 }
 0xff8   :  { %2215 = vrot.lane.b32.xlu0 %v4277_v26, %s4166_s3 }
0x1063   :  { %v1966_v32 = vpop.xlane.xlu1 %1965 }
0x1064   :  { %3936 = vrcp.f32 %v1966_v32 }
0x1067   :  { %v1969_v33 = vpop.xlane.xlu0 %1968  ;;  %v2138_v39 = vpop.permute.xlu1 %2137 }
0x1068   :  { %3938 = vrcp.f32 %v1969_v33 }
0x106b   :  { %v2051_v34 = vpop.permute.xlu0 %2050 }
0x106c   :  { %3780 = vmatpush3.msra.mxu1 %v2051_v34 }
0x106d   :  { %3789 = vmatprep.subr.mxu1 %v4154_v12 }
0x106f   :  { %v2216_v40 = vpop.permute.xlu0 %2215 }
0x1071   :  { %v3937_v35 = vpop.eup %3936 }
0x1072   :  { %v1972_v36 = vmul.f32 %v3937_v35, %v1962_v19 }
0x1074   :  { %3777 = vmatmul.mubr.msk.f32.vlgmr.msra.gmra.mxu0 %vm474_vm3, %v1972_v36 }
0x1075   :  { %v3939_v37 = vpop.eup %3938  ;;  %3785 = vmatpush3.xpose.msk.msra.mxu0 %vm321_vm2, %v2140_v30  ;;  %3786 = vmatprep.mubr.msk.f32.mxu0 %vm4155_vm1, %v4154_v12 }
0x1076   :  { %v1973_v38 = vmul.f32 %v3939_v37, %v1963_v25  ;;  %3794 = vmatprep.subr.mxu0 %v4154_v12 }
0x1078   :  { %3782 = vmatmul.mubr.msk.f32.vlgmr.msra.gmra.mxu1 %vm474_vm3, %v1973_v38  ;;  %3787 = vmatmul.mubr.msk.f32.vlgmr.msra.gmra.mxu0 %vm321_vm2, %v2138_v39 }
0x1079   :  { %3790 = vmatpush3.xpose.msk.msra.mxu1 %vm321_vm2, %v2218_v31  ;;  %3791 = vmatprep.mubr.msk.f32.mxu1 %vm4155_vm1, %v4154_v12 }
0x107a   :  { %3799 = vmatprep.subr.mxu1 %v4154_v12  ;;  %3796 = vmatprep.mubr.msk.f32.mxu0 %vm4155_vm1, %v4154_v12 }
0x107c   :  { %3792 = vmatmul.mubr.msk.f32.vlgmr.msra.gmra.mxu1 %vm321_vm2, %v2216_v40 }
0x107d   :  { %3801 = vmatprep.mubr.msk.f32.mxu1 %vm4155_vm1, %v4154_v12 }
0x1134   :  { %v4476_v41 = vpop.f32.mrf.mxu0 }
0x1136   :  { %v3778_v42 = vpop.f32.mrf.mxu0 }
0x1138   :  { %v4478_v43 = vpop.f32.mrf.mxu1  ;;  %v2211_v44 = vpop.f32.mrf.mxu0 }
0x1139   :  { %v2293_v45 = vsel %vm474_vm3, %v2211_v44, -inf }
0x113a   :  { %v3783_v46 = vpop.f32.mrf.mxu1  ;;  %2294 = vmax.xlane.f32.xlu1 %v2293_v45  ;;  %v3788_v48 = vpop.f32.mrf.mxu0 }
0x113c   :  { %v2289_v50 = vpop.f32.mrf.mxu1 }
0x113d   :  { %v2296_v51 = vsel %vm474_vm3, %v2289_v50, -inf }
0x113e   :  { %2297 = vmax.xlane.f32.xlu0 %v2296_v51  ;;  %v3793_v54 = vpop.f32.mrf.mxu1 }
0x11c3   :  { %v2295_v55 = vpop.xlane.xlu1 %2294 }
0x11c4   :  { %vm2299_vm10 = vcmp.ge.f32.partialorder %v2211_v44, %v2295_v55  ;;  %v2321_v7 = vsub.f32 %v2211_v44, %v2295_v55 }
0x11c5   :  { %v2301_v56 = vsel %vm2299_vm10, -1e+30, %v2211_v44 }
0x11c6   :  { %v2303_v58 = vsel %vm474_vm3, %v2301_v56, -inf  ;;  %v2323_v8 = vmul.f32 1.442695, %v2321_v7 }
0x11c7   :  { %v2298_v60 = vpop.xlane.xlu0 %2297  ;;  %2304 = vmax.xlane.f32.xlu0 %v2303_v58 }
0x11c8   :  { %vm2300_vm11 = vcmp.ge.f32.partialorder %v2289_v50, %v2298_v60  ;;  %v2322_v9 = vsub.f32 %v2289_v50, %v2298_v60  ;;  %3940 = vpow2.f32 %v2323_v8 }
0x11c9   :  { %v2302_v61 = vsel %vm2300_vm11, -1e+30, %v2289_v50 }
0x11ca   :  { %v2306_v62 = vsel %vm474_vm3, %v2302_v61, -inf  ;;  %v2325_v10 = vmul.f32 1.442695, %v2322_v9 }
0x11cb   :  { %2307 = vmax.xlane.f32.xlu0 %v2306_v62 }
0x11cc   :  { %3942 = vpow2.f32 %v2325_v10 }
0x11d5   :  { %v3941_v13 = vpop.eup %3940 }
0x11d9   :  { %v3943_v19 = vpop.eup %3942 }
0x1250   :  { %v2305_v63 = vpop.xlane.xlu0 %2304 }
0x1251   :  { %vm2309_vm12 = vcmp.ge.f32.partialorder %v2301_v56, %v2305_v63 }
0x1252   :  { %v2311_v0 = vsel %vm2309_vm12, -1e+30, %v2301_v56 }
0x1253   :  { %v2313_v1 = vsel %vm474_vm3, %v2311_v0, -inf }
0x1254   :  { %2314 = vmax.xlane.f32.xlu1 %v2313_v1  ;;  %v2308_v2 = vpop.xlane.xlu0 %2307 }
0x1255   :  { %vm2310_vm13 = vcmp.ge.f32.partialorder %v2302_v61, %v2308_v2 }
0x1256   :  { %v2312_v4 = vsel %vm2310_vm13, -1e+30, %v2302_v61 }
0x1257   :  { %v2316_v6 = vsel %vm474_vm3, %v2312_v4, -inf }
0x1258   :  { %2317 = vmax.xlane.f32.xlu0 %v2316_v6 }
0x1265   :  { %2339 = vrot.lane.b32.xlu1 %v4304_v52, %s4167_s19 }
0x1269   :  { %2504 = vrot.lane.b32.xlu1 %v4279_v28, %s4168_s20 }
0x126d   :  { %2582 = vrot.lane.b32.xlu1 %v4275_v23, %s4168_s20 }
0x12dd   :  { %v2315_v11 = vpop.xlane.xlu1 %2314 }
0x12de   :  { %vm2319_vm14 = vcmp.ge.f32.partialorder %v2211_v44, %v2315_v11 }
0x12df   :  { %v2327_v15 = vsel %vm2319_vm14, %v3941_v13, 0.0  ;;  %vm1039_vm14 = vcmask 64544  }
0x12e0   :  { %v2329_v16 = vsel %vm474_vm3, %v2327_v15, 0.0 }
0x12e1   :  { %2330 = vadd.xlane.f32.xlu1 %v2329_v16  ;;  %v2340_v17 = vpop.permute.xlu1 %2339  ;;  %v2318_v18 = vpop.xlane.xlu0 %2317 }
0x12e2   :  { %vm2320_vm15 = vcmp.ge.f32.partialorder %v2289_v50, %v2318_v18  ;;  %3795 = vmatpush3.msra.mxu0 %v2340_v17 }
0x12e3   :  { %v2328_v20 = vsel %vm2320_vm15, %v3943_v19, 0.0  ;;  %3804 = vmatprep.subr.mxu0 %v4154_v12  ;;  %vm1404_vm15 = vcmask 97344  }
0x12e4   :  { %v2332_v21 = vsel %vm474_vm3, %v2328_v20, 0.0 }
0x12e5   :  { %2333 = vadd.xlane.f32.xlu0 %v2332_v21  ;;  %v2505_v22 = vpop.permute.xlu1 %2504 }
0x12e9   :  { %v2583_v24 = vpop.permute.xlu1 %2582 }
0x12f2   :  { %2502 = vrot.lane.b32.xlu1 %v4284_v29, %s4168_s20 }
0x12fb   :  { %2415 = vrot.lane.b32.xlu0 %v4306_v53, %s4167_s19 }
0x12ff   :  { %2580 = vrot.lane.b32.xlu0 %v4277_v26, %s4168_s20 }
0x136a   :  { %v2331_v25 = vpop.xlane.xlu1 %2330 }
0x136b   :  { %3944 = vrcp.f32 %v2331_v25 }
0x136e   :  { %v2334_v27 = vpop.xlane.xlu0 %2333  ;;  %v2503_v35 = vpop.permute.xlu1 %2502 }
0x136f   :  { %3946 = vrcp.f32 %v2334_v27 }
0x1372   :  { %v2416_v30 = vpop.permute.xlu0 %2415 }
0x1373   :  { %3800 = vmatpush3.msra.mxu1 %v2416_v30 }
0x1374   :  { %3809 = vmatprep.subr.mxu1 %v4154_v12 }
0x1376   :  { %v2581_v36 = vpop.permute.xlu0 %2580 }
0x1378   :  { %v3945_v31 = vpop.eup %3944 }
0x1379   :  { %v2337_v32 = vmul.f32 %v3945_v31, %v2327_v15 }
0x137b   :  { %3797 = vmatmul.mubr.msk.f32.vlgmr.msra.gmra.mxu0 %vm474_vm3, %v2337_v32 }
0x137c   :  { %v3947_v33 = vpop.eup %3946  ;;  %3805 = vmatpush3.xpose.msk.msra.mxu0 %vm321_vm2, %v2505_v22  ;;  %3806 = vmatprep.mubr.msk.f32.mxu0 %vm4155_vm1, %v4154_v12 }
0x137d   :  { %v2338_v34 = vmul.f32 %v3947_v33, %v2328_v20  ;;  %3814 = vmatprep.subr.mxu0 %v4154_v12 }
0x137f   :  { %3802 = vmatmul.mubr.msk.f32.vlgmr.msra.gmra.mxu1 %vm474_vm3, %v2338_v34  ;;  %3807 = vmatmul.mubr.msk.f32.vlgmr.msra.gmra.mxu0 %vm321_vm2, %v2503_v35 }
0x1380   :  { %3810 = vmatpush3.xpose.msk.msra.mxu1 %vm321_vm2, %v2583_v24  ;;  %3811 = vmatprep.mubr.msk.f32.mxu1 %vm4155_vm1, %v4154_v12 }
0x1381   :  { %3819 = vmatprep.subr.mxu1 %v4154_v12  ;;  %3816 = vmatprep.mubr.msk.f32.mxu0 %vm4155_vm1, %v4154_v12 }
0x1383   :  { %3812 = vmatmul.mubr.msk.f32.vlgmr.msra.gmra.mxu1 %vm321_vm2, %v2581_v36 }
0x1384   :  { %3821 = vmatprep.mubr.msk.f32.mxu1 %vm4155_vm1, %v4154_v12 }
0x143b   :  { %v4512_v37 = vpop.f32.mrf.mxu0 }
0x143d   :  { %v3798_v38 = vpop.f32.mrf.mxu0 }
0x143f   :  { %v4514_v39 = vpop.f32.mrf.mxu1  ;;  %v2576_v40 = vpop.f32.mrf.mxu0 }
0x1440   :  { %v2658_v42 = vsel %vm474_vm3, %v2576_v40, -inf }
0x1441   :  { %v3803_v44 = vpop.f32.mrf.mxu1  ;;  %2659 = vmax.xlane.f32.xlu1 %v2658_v42  ;;  %v3808_v45 = vpop.f32.mrf.mxu0 }
0x1443   :  { %v2654_v46 = vpop.f32.mrf.mxu1 }
0x1444   :  { %v2661_v48 = vsel %vm474_vm3, %v2654_v46, -inf }
0x1445   :  { %2662 = vmax.xlane.f32.xlu0 %v2661_v48  ;;  %v3813_v50 = vpop.f32.mrf.mxu1 }
0x14ca   :  { %v2660_v51 = vpop.xlane.xlu1 %2659 }
0x14cb   :  { %vm2664_vm4 = vcmp.ge.f32.partialorder %v2576_v40, %v2660_v51  ;;  %v2686_v4 = vsub.f32 %v2576_v40, %v2660_v51 }
0x14cc   :  { %v2666_v54 = vsel %vm2664_vm4, -1e+30, %v2576_v40  ;;  %vm1769_vm4 = vcmask 130144  }
0x14cd   :  { %v2668_v55 = vsel %vm474_vm3, %v2666_v54, -inf  ;;  %v2688_v6 = vmul.f32 1.442695, %v2686_v4 }
0x14ce   :  { %v2663_v56 = vpop.xlane.xlu0 %2662  ;;  %2669 = vmax.xlane.f32.xlu0 %v2668_v55 }
0x14cf   :  { %vm2665_vm5 = vcmp.ge.f32.partialorder %v2654_v46, %v2663_v56  ;;  %v2687_v7 = vsub.f32 %v2654_v46, %v2663_v56  ;;  %3948 = vpow2.f32 %v2688_v6 }
0x14d0   :  { %v2667_v58 = vsel %vm2665_vm5, -1e+30, %v2654_v46  ;;  %vm2134_vm5 = vcmask 162944  }
0x14d1   :  { %v2671_v60 = vsel %vm474_vm3, %v2667_v58, -inf  ;;  %v2690_v8 = vmul.f32 1.442695, %v2687_v7 }
0x14d2   :  { %2672 = vmax.xlane.f32.xlu0 %v2671_v60 }
0x14d3   :  { %3950 = vpow2.f32 %v2690_v8 }
0x14dc   :  { %v3949_v10 = vpop.eup %3948 }
0x14e0   :  { %v3951_v17 = vpop.eup %3950 }
0x1557   :  { %v2670_v61 = vpop.xlane.xlu0 %2669 }
0x1558   :  { %vm2674_vm6 = vcmp.ge.f32.partialorder %v2666_v54, %v2670_v61 }
0x1559   :  { %v2676_v62 = vsel %vm2674_vm6, -1e+30, %v2666_v54  ;;  %vm2499_vm6 = vcmask 195744  }
0x155a   :  { %v2678_v63 = vsel %vm474_vm3, %v2676_v62, -inf }
0x155b   :  { %2679 = vmax.xlane.f32.xlu1 %v2678_v63  ;;  %v2673_v0 = vpop.xlane.xlu0 %2672 }
0x155c   :  { %vm2675_vm7 = vcmp.ge.f32.partialorder %v2667_v58, %v2673_v0 }
0x155d   :  { %v2677_v1 = vsel %vm2675_vm7, -1e+30, %v2667_v58  ;;  %vm2864_vm7 = vcmask 228544  }
0x155e   :  { %v2681_v2 = vsel %vm474_vm3, %v2677_v1, -inf }
0x155f   :  { %2682 = vmax.xlane.f32.xlu0 %v2681_v2 }
0x156c   :  { %2704 = vrot.lane.b32.xlu1 %v4304_v52, %s4169_s21 }
0x1570   :  { %2869 = vrot.lane.b32.xlu1 %v4279_v28, %s4170_s22 }
0x1574   :  { %2947 = vrot.lane.b32.xlu1 %v4275_v23, %s4170_s22 }
0x15e4   :  { %v2680_v9 = vpop.xlane.xlu1 %2679 }
0x15e5   :  { %vm2684_vm8 = vcmp.ge.f32.partialorder %v2576_v40, %v2680_v9 }
0x15e6   :  { %v2692_v11 = vsel %vm2684_vm8, %v3949_v10, 0.0 }
0x15e7   :  { %v2694_v13 = vsel %vm474_vm3, %v2692_v11, 0.0 }
0x15e8   :  { %2695 = vadd.xlane.f32.xlu1 %v2694_v13  ;;  %v2705_v15 = vpop.permute.xlu1 %2704  ;;  %v2683_v16 = vpop.xlane.xlu0 %2682 }
0x15e9   :  { %vm2685_vm9 = vcmp.ge.f32.partialorder %v2654_v46, %v2683_v16  ;;  %3815 = vmatpush3.msra.mxu0 %v2705_v15 }
0x15ea   :  { %v2693_v28 = vsel %vm2685_vm9, %v3951_v17, 0.0  ;;  %3824 = vmatprep.subr.mxu0 %v4154_v12 }
0x15eb   :  { %v2697_v23 = vsel %vm474_vm3, %v2693_v28, 0.0 }
0x15ec   :  { %2698 = vadd.xlane.f32.xlu0 %v2697_v23  ;;  %v2870_v18 = vpop.permute.xlu1 %2869 }
0x15f0   :  { %v2948_v19 = vpop.permute.xlu1 %2947 }
0x15f9   :  { %2867 = vrot.lane.b32.xlu1 %v4284_v29, %s4170_s22 }
0x1602   :  { %2780 = vrot.lane.b32.xlu0 %v4306_v53, %s4169_s21 }
0x1606   :  { %2945 = vrot.lane.b32.xlu0 %v4277_v26, %s4170_s22 }
0x1671   :  { %v2696_v20 = vpop.xlane.xlu1 %2695 }
0x1672   :  { %3952 = vrcp.f32 %v2696_v20 }
0x1675   :  { %v2699_v21 = vpop.xlane.xlu0 %2698  ;;  %v2868_v29 = vpop.permute.xlu1 %2867 }
0x1676   :  { %3954 = vrcp.f32 %v2699_v21 }
0x1679   :  { %v2781_v22 = vpop.permute.xlu0 %2780 }
0x167a   :  { %3820 = vmatpush3.msra.mxu1 %v2781_v22 }
0x167b   :  { %3829 = vmatprep.subr.mxu1 %v4154_v12 }
0x167d   :  { %v2946_v30 = vpop.permute.xlu0 %2945 }
0x167f   :  { %v3953_v24 = vpop.eup %3952 }
0x1680   :  { %v2702_v25 = vmul.f32 %v3953_v24, %v2692_v11 }
0x1682   :  { %3817 = vmatmul.mubr.msk.f32.vlgmr.msra.gmra.mxu0 %vm474_vm3, %v2702_v25 }
0x1683   :  { %v3955_v27 = vpop.eup %3954  ;;  %3825 = vmatpush3.xpose.msk.msra.mxu0 %vm321_vm2, %v2870_v18  ;;  %3826 = vmatprep.mubr.msk.f32.mxu0 %vm4155_vm1, %v4154_v12 }
0x1684   :  { %v2703_v26 = vmul.f32 %v3955_v27, %v2693_v28  ;;  %3834 = vmatprep.subr.mxu0 %v4154_v12 }
0x1686   :  { %3822 = vmatmul.mubr.msk.f32.vlgmr.msra.gmra.mxu1 %vm474_vm3, %v2703_v26  ;;  %3827 = vmatmul.mubr.msk.f32.vlgmr.msra.gmra.mxu0 %vm321_vm2, %v2868_v29  ;;  %v3972_v29 = vld [vmem:[#allocation6] sm:$0xff] }
0x1687   :  { %3830 = vmatpush3.xpose.msk.msra.mxu1 %vm321_vm2, %v2948_v19  ;;  %3831 = vmatprep.mubr.msk.f32.mxu1 %vm4155_vm1, %v4154_v12 }
0x1688   :  { %3839 = vmatprep.subr.mxu1 %v4154_v12  ;;  %3836 = vmatprep.mubr.msk.f32.mxu0 %vm4155_vm1, %v4154_v12 }
0x168a   :  { %3832 = vmatmul.mubr.msk.f32.vlgmr.msra.gmra.mxu1 %vm321_vm2, %v2946_v30 }
0x168b   :  { %3841 = vmatprep.mubr.msk.f32.mxu1 %vm4155_vm1, %v4154_v12 }
0x1742   :  { %v4548_v31 = vpop.f32.mrf.mxu0 }
0x1744   :  { %v3818_v32 = vpop.f32.mrf.mxu0 }
0x1746   :  { %v4550_v33 = vpop.f32.mrf.mxu1  ;;  %v2941_v34 = vpop.f32.mrf.mxu0 }
0x1747   :  { %v3023_v35 = vsel %vm474_vm3, %v2941_v34, -inf }
0x1748   :  { %v3823_v36 = vpop.f32.mrf.mxu1  ;;  %3024 = vmax.xlane.f32.xlu1 %v3023_v35  ;;  %v3828_v38 = vpop.f32.mrf.mxu0 }
0x174a   :  { %v3019_v40 = vpop.f32.mrf.mxu1 }
0x174b   :  { %v3026_v42 = vsel %vm474_vm3, %v3019_v40, -inf }
0x174c   :  { %3027 = vmax.xlane.f32.xlu0 %v3026_v42  ;;  %v3833_v44 = vpop.f32.mrf.mxu1 }
0x17d1   :  { %v3025_v45 = vpop.xlane.xlu1 %3024 }
0x17d2   :  { %vm3029_vm2 = vcmp.ge.f32.partialorder %v2941_v34, %v3025_v45  ;;  %v3051_v62 = vsub.f32 %v2941_v34, %v3025_v45 }
0x17d3   :  { %v3031_v46 = vsel %vm3029_vm2, -1e+30, %v2941_v34 }
0x17d4   :  { %v3033_v12 = vsel %vm474_vm3, %v3031_v46, -inf  ;;  %v3053_v63 = vmul.f32 1.442695, %v3051_v62 }
0x17d5   :  { %v3028_v48 = vpop.xlane.xlu0 %3027  ;;  %3034 = vmax.xlane.f32.xlu0 %v3033_v12 }
0x17d6   :  { %vm3030_vm1 = vcmp.ge.f32.partialorder %v3019_v40, %v3028_v48  ;;  %v3052_v0 = vsub.f32 %v3019_v40, %v3028_v48  ;;  %3956 = vpow2.f32 %v3053_v63 }
0x17d7   :  { %v3032_v50 = vsel %vm3030_vm1, -1e+30, %v3019_v40 }
0x17d8   :  { %v3036_v51 = vsel %vm474_vm3, %v3032_v50, -inf  ;;  %v3055_v1 = vmul.f32 1.442695, %v3052_v0 }
0x17d9   :  { %3037 = vmax.xlane.f32.xlu0 %v3036_v51  ;;  %v3278_v51 = vld [vmem:[#allocation11 + $0x18] sm:$0xff] }
0x17da   :  { %3958 = vpow2.f32 %v3055_v1  ;;  %v3265_v1 = vsub.s32 5, %v4271_v14 }
0x17e3   :  { %v3957_v4 = vpop.eup %3956 }
0x17e7   :  { %v3959_v9 = vpop.eup %3958 }
0x185e   :  { %v3035_v54 = vpop.xlane.xlu0 %3034 }
0x185f   :  { %vm3039_vm10 = vcmp.ge.f32.partialorder %v3031_v46, %v3035_v54  ;;  %v3277_v54 = vld [vmem:[#allocation11 + $0x10] sm:$0xff] }
0x1860   :  { %v3041_v55 = vsel %vm3039_vm10, -1e+30, %v3031_v46 }
0x1861   :  { %v3043_v56 = vsel %vm474_vm3, %v3041_v55, -inf  ;;  %v3276_v55 = vld [vmem:[#allocation11 + $0x8] sm:$0xff] }
0x1862   :  { %3044 = vmax.xlane.f32.xlu1 %v3043_v56  ;;  %v3038_v58 = vpop.xlane.xlu0 %3037  ;;  %v3275_v56 = vld [vmem:[#allocation11] sm:$0xff] }
0x1863   :  { %vm3040_vm11 = vcmp.ge.f32.partialorder %v3032_v50, %v3038_v58 }
0x1864   :  { %v3042_v60 = vsel %vm3040_vm11, -1e+30, %v3032_v50 }
0x1865   :  { %v3046_v61 = vsel %vm474_vm3, %v3042_v60, -inf }
0x1866   :  { %3047 = vmax.xlane.f32.xlu0 %v3046_v61 }
0x18eb   :  { %v3045_v2 = vpop.xlane.xlu1 %3044 }
0x18ec   :  { %vm3049_vm12 = vcmp.ge.f32.partialorder %v2941_v34, %v3045_v2  ;;  %v3271_v2 = vsub.s32 6, %v4271_v14 }
0x18ed   :  { %v3057_v6 = vsel %vm3049_vm12, %v3957_v4, 0.0  ;;  %v4584_v4 = vld [vmem:[#allocation14] sm:$0xff] }
0x18ee   :  { %v3059_v7 = vsel %vm474_vm3, %v3057_v6, 0.0 }
0x18ef   :  { %3060 = vadd.xlane.f32.xlu1 %v3059_v7  ;;  %v3048_v8 = vpop.xlane.xlu0 %3047 }
0x18f0   :  { %vm3050_vm13 = vcmp.ge.f32.partialorder %v3019_v40, %v3048_v8 }
0x18f1   :  { %v3058_v10 = vsel %vm3050_vm13, %v3959_v9, 0.0  ;;  %v3272_v9 = vrot.slane %v4584_v4, %v3271_v2 }
0x18f2   :  { %v3062_v11 = vsel %vm474_vm3, %v3058_v10, 0.0 }
0x18f3   :  { %3063 = vadd.xlane.f32.xlu0 %v3062_v11 }
0x1900   :  { %3069 = vrot.lane.b32.xlu1 %v4304_v52, %s4171_s23 }
0x1904   :  { %1033 = vrot.lane.b32.xlu1 %v4368_v3, %s4172_s24 }
0x1908   :  { %1035 = vrot.lane.b32.xlu1 %v4370_v5, %s4172_s24 }
0x1909   :  { %3145 = vrot.lane.b32.xlu0 %v4306_v53, %s4171_s23 }
0x190c   :  { %1398 = vrot.lane.b32.xlu1 %v4404_v57, %s4148_s30 }
0x190d   :  { %1400 = vrot.lane.b32.xlu0 %v4406_v59, %s4148_s30 }
0x1910   :  { %1763 = vrot.lane.b32.xlu1 %v4440_v47, %s4173_s5 }
0x1911   :  { %1765 = vrot.lane.b32.xlu0 %v4442_v49, %s4173_s5 }
0x1914   :  { %2128 = vrot.lane.b32.xlu1 %v4476_v41, %s4174_s25 }
0x1915   :  { %2130 = vrot.lane.b32.xlu0 %v4478_v43, %s4174_s25 }
0x1918   :  { %2493 = vrot.lane.b32.xlu1 %v4512_v37, %s4175_s26 }
0x1919   :  { %2495 = vrot.lane.b32.xlu0 %v4514_v39, %s4175_s26 }
0x191c   :  { %2858 = vrot.lane.b32.xlu1 %v4548_v31, %s4176_s0 }
0x191d   :  { %2860 = vrot.lane.b32.xlu0 %v4550_v33, %s4176_s0  ;;  %v3973_v33 = vld [vmem:[#allocation6 + $0x8] sm:$0xff] }
0x1978   :  { %v3061_v52 = vpop.xlane.xlu1 %3060 }
0x1979   :  { %3960 = vrcp.f32 %v3061_v52 }
0x197c   :  { %v3070_v53 = vpop.permute.xlu1 %3069  ;;  %v3064_v3 = vpop.xlane.xlu0 %3063 }
0x197d   :  { %3962 = vrcp.f32 %v3064_v3  ;;  %3835 = vmatpush3.msra.mxu0 %v3070_v53 }
0x197e   :  { %3844 = vmatprep.subr.mxu0 %v3278_v51 }
0x1980   :  { %v1034_v5 = vpop.permute.xlu1 %1033  ;;  %v3146_v57 = vpop.permute.xlu0 %3145 }
0x1981   :  { %1040 = vst.msk [vmem:[#allocation2] sm:$0xff] %vm1039_vm14, %v1034_v5  ;;  %3840 = vmatpush3.msra.mxu1 %v3146_v57  ;;  %v3369_v57 = vld [vmem:[#allocation12 + $0x18] sm:$0xff] }
0x1982   :  { %3855 = vmatprep.subr.mxu1 %v3369_v57 }
0x1984   :  { %v1036_v59 = vpop.permute.xlu1 %1035  ;;  %v1401_v47 = vpop.permute.xlu0 %1400 }
0x1985   :  { %1041 = vst.msk [vmem:[#allocation2 + $0x8] sm:$0xff] %vm1039_vm14, %v1036_v59  ;;  %v3368_v59 = vld [vmem:[#allocation12 + $0x10] sm:$0xff] }
0x1986   :  { %v3961_v49 = vpop.eup %3960  ;;  %1406 = vst.msk [vmem:[#allocation2 + $0x8] sm:$0xff] %vm1404_vm15, %v1401_v47  ;;  %v3367_v47 = vld [vmem:[#allocation12 + $0x8] sm:$0xff] }
0x1987   :  { %v3067_v41 = vmul.f32 %v3961_v49, %v3057_v6  ;;  %v3266_v6 = vrot.slane %v4584_v4, %v3265_v1  ;;  %v3366_v49 = vld [vmem:[#allocation12] sm:$0xff] }
0x1988   :  { %v1399_v43 = vpop.permute.xlu1 %1398  ;;  %v1766_v37 = vpop.permute.xlu0 %1765 }
0x1989   :  { %1405 = vst.msk [vmem:[#allocation2] sm:$0xff] %vm1404_vm15, %v1399_v43  ;;  %3837 = vmatmul.mubr.msk.f32.vlgmr.msra.gmra.mxu0 %vm474_vm3, %v3067_v41  ;;  %v3281_v41 = vsub.s32 3, %v4271_v14 }
0x198a   :  { %1771 = vst.msk [vmem:[#allocation2 + $0x8] sm:$0xff] %vm1769_vm4, %v1766_v37  ;;  %v3963_v39 = vpop.eup %3962  ;;  %3845 = vmatpush3.msra.mxu0 %v3278_v51 }
0x198b   :  { %v3068_v13 = vmul.f32 %v3963_v39, %v3058_v10  ;;  %3846 = vmatprep.subr.mxu0 %v3277_v54  ;;  %v3282_v43 = vrot.slane %v4584_v4, %v3281_v41 }
0x198c   :  { %v1764_v15 = vpop.permute.xlu1 %1763  ;;  %v2131_v16 = vpop.permute.xlu0 %2130  ;;  %3847 = vmatpush3.msra.mxu0 %v3277_v54 }
0x198d   :  { %1770 = vst.msk [vmem:[#allocation2] sm:$0xff] %vm1769_vm4, %v1764_v15  ;;  %3842 = vmatmul.mubr.msk.f32.vlgmr.msra.gmra.mxu1 %vm474_vm3, %v3068_v13  ;;  %vm3229_vm3 = vcmask 261344   ;;  %3848 = vmatprep.subr.mxu0 %v3276_v55 }
0x198e   :  { %2136 = vst.msk [vmem:[#allocation2 + $0x8] sm:$0xff] %vm2134_vm5, %v2131_v16  ;;  %3849 = vmatpush3.msra.mxu0 %v3276_v55  ;;  %3856 = vmatpush3.msra.mxu1 %v3369_v57 }
0x198f   :  { %3850 = vmatprep.subr.mxu0 %v3275_v56  ;;  %3857 = vmatprep.subr.mxu1 %v3368_v59 }
0x1990   :  { %v2129_v17 = vpop.permute.xlu1 %2128  ;;  %v2496_v28 = vpop.permute.xlu0 %2495  ;;  %3851 = vmatpush3.msra.mxu0 %v3275_v56  ;;  %3858 = vmatpush3.msra.mxu1 %v3368_v59  ;;  %v3573_v56 = vld [vmem:[#allocation14 + $0x8] ss:$0 sm:$0xff] }
0x1991   :  { %2135 = vst.msk [vmem:[#allocation2] sm:$0xff] %vm2134_vm5, %v2129_v17  ;;  %3859 = vmatprep.subr.mxu1 %v3367_v47 }
0x1992   :  { %2501 = vst.msk [vmem:[#allocation2 + $0x8] sm:$0xff] %vm2499_vm6, %v2496_v28  ;;  %3860 = vmatpush3.msra.mxu1 %v3367_v47  ;;  %v3372_v28 = vsub.s32 4, %v4271_v14 }
0x1993   :  { %3861 = vmatprep.subr.mxu1 %v3366_v49 }
0x1994   :  { %v2494_v23 = vpop.permute.xlu1 %2493  ;;  %v2861_v18 = vpop.permute.xlu0 %2860  ;;  %3862 = vmatpush3.msra.mxu1 %v3366_v49 }
0x1995   :  { %2500 = vst.msk [vmem:[#allocation2] sm:$0xff] %vm2499_vm6, %v2494_v23  ;;  %v3373_v23 = vrot.slane %v4584_v4, %v3372_v28 }
0x1996   :  { %2866 = vst.msk [vmem:[#allocation2 + $0x8] sm:$0xff] %vm2864_vm7, %v2861_v18 }
0x1998   :  { %v2859_v19 = vpop.permute.xlu1 %2858 }
0x1999   :  { %2865 = vst.msk [vmem:[#allocation2] sm:$0xff] %vm2864_vm7, %v2859_v19 }
0x1a49   :  { %v3141_v20 = vpop.f32.mrf.mxu0 }
0x1a4a   :  { %3223 = vrot.lane.b32.xlu1 %v3141_v20, %s4177_s27 }
0x1a4b   :  { %v3838_v21 = vpop.f32.mrf.mxu0 }
0x1a4d   :  { %v3217_v22 = vpop.f32.mrf.mxu1 }
0x1a4e   :  { %3225 = vrot.lane.b32.xlu0 %v3217_v22, %s4177_s27 }
0x1a4f   :  { %v3843_v24 = vpop.f32.mrf.mxu1 }
0x1abc   :  { %v3224_v25 = vpop.permute.xlu1 %3223 }
0x1abd   :  { %3230 = vst.msk [vmem:[#allocation2] sm:$0xff] %vm3229_vm3, %v3224_v25 }
0x1ac0   :  { %v3226_v27 = vpop.permute.xlu0 %3225 }
0x1ac1   :  { %3231 = vst.msk [vmem:[#allocation2 + $0x8] sm:$0xff] %vm3229_vm3, %v3226_v27 }
0x1ac4   :  { %v3232_v26 = vld [vmem:[#allocation2] sm:$0xff] }
0x1ac5   :  { %v3234_v30 = vadd.f32 %v3972_v29, %v3232_v26 }
0x1ac7   :  { %v3236_v31 = vsel %vm136_vm0, %v3234_v30, 0.0 }
0x1ac8   :  { %3237 = vadd.xlane.f32.xlu1 %v3236_v31  ;;  %v3233_v32 = vld [vmem:[#allocation2 + $0x8] sm:$0xff] }
0x1ac9   :  { %v3235_v34 = vadd.f32 %v3973_v33, %v3233_v32 }
0x1acb   :  { %v3239_v35 = vsel %vm136_vm0, %v3235_v34, 0.0 }
0x1acc   :  { %3240 = vadd.xlane.f32.xlu0 %v3239_v35 }
0x1b51   :  { %v3238_v36 = vpop.xlane.xlu1 %3237 }
0x1b52   :  { %v3243_v38 = vmul.f32 0.03125, %v3238_v36 }
0x1b54   :  { %v3245_v40 = vsub.f32 %v3234_v30, %v3243_v38 }
0x1b55   :  { %v3241_v42 = vpop.xlane.xlu0 %3240 }
0x1b56   :  { %v3244_v44 = vmul.f32 0.03125, %v3241_v42  ;;  %v3247_v45 = vmul.f32 %v3245_v40, %v3245_v40 }
0x1b58   :  { %v3246_v46 = vsub.f32 %v3235_v34, %v3244_v44  ;;  %v3249_v12 = vsel %vm136_vm0, %v3247_v45, 0.0 }
0x1b59   :  { %3250 = vadd.xlane.f32.xlu0 %v3249_v12 }
0x1b5a   :  { %v3248_v48 = vmul.f32 %v3246_v46, %v3246_v46 }
0x1b5c   :  { %v3252_v50 = vsel %vm136_vm0, %v3248_v48, 0.0  ;;  %v3485_v48 = vsub.s32 7, %v4271_v14 }
0x1b5d   :  { %3253 = vadd.xlane.f32.xlu0 %v3252_v50 }
0x1b5e   :  { %v3486_v50 = vrot.slane %v4584_v4, %v3485_v48 }
0x1be2   :  { %v3251_v58 = vpop.xlane.xlu0 %3250 }
0x1be3   :  { %v3255_v60 = vmul.f32 0.03125, %v3251_v58 }
0x1be5   :  { %v3257_v61 = vadd.f32 1e-05, %v3255_v60 }
0x1be6   :  { %v3254_v62 = vpop.xlane.xlu0 %3253 }
0x1be7   :  { %3964 = vrsqrt.f32 %v3257_v61  ;;  %v3256_v63 = vmul.f32 0.03125, %v3254_v62 }
0x1be9   :  { %v3258_v0 = vadd.f32 1e-05, %v3256_v63 }
0x1beb   :  { %3966 = vrsqrt.f32 %v3258_v0 }
0x1bf4   :  { %v3965_v7 = vpop.eup %3964 }
0x1bf5   :  { %v3261_v8 = vmul.f32 %v3965_v7, %v3245_v40 }
0x1bf7   :  { %v3267_v10 = vmul.f32 %v3266_v6, %v3261_v8 }
0x1bf8   :  { %v3967_v11 = vpop.eup %3966 }
0x1bf9   :  { %v3262_v52 = vmul.f32 %v3967_v11, %v3246_v46  ;;  %v3273_v53 = vadd.f32 %v3272_v9, %v3267_v10 }
0x1bfb   :  { %v3268_v3 = vmul.f32 %v3266_v6, %v3262_v52  ;;  %3852 = vmatprep.mubr.msk.f32.mxu0 %vm136_vm0, %v3273_v53 }
0x1bfd   :  { %v3274_v5 = vadd.f32 %v3272_v9, %v3268_v3 }
0x1bff   :  { %3853 = vmatmul.mubr.msk.f32.vlgmr.msra.gmra.mxu0 %vm136_vm0, %v3274_v5 }
0x1cbf   :  { %v3854_v37 = vpop.f32.mrf.mxu0 }
0x1cc0   :  { %v3361_v39 = vadd.f32 %v3854_v37, %v3282_v43 }
0x1cc1   :  { %v3355_v13 = vpop.f32.mrf.mxu0 }
0x1cc2   :  { %v3356_v15 = vadd.f32 %v3355_v13, %v3282_v43  ;;  %v3365_v17 = vmax.f32 %v3361_v39, 0.0 }
0x1cc4   :  { %v3364_v16 = vmax.f32 %v3356_v15, 0.0 }
0x1cc6   :  { %3863 = vmatprep.mubr.msk.f32.mxu1 %vm136_vm0, %v3364_v16 }
0x1cc7   :  { %3864 = vmatmul.mubr.msk.f32.vlgmr.msra.gmra.mxu1 %vm136_vm0, %v3365_v17 }
0x1d87   :  { %v3865_v18 = vpop.f32.mrf.mxu1 }
0x1d88   :  { %v3452_v19 = vadd.f32 %v3865_v18, %v3373_v23 }
0x1d89   :  { %v3446_v20 = vpop.f32.mrf.mxu1 }
0x1d8a   :  { %v3456_v21 = vadd.f32 %v3452_v19, %v3274_v5  ;;  %v3447_v22 = vadd.f32 %v3446_v20, %v3373_v23 }
0x1d8c   :  { %v3455_v24 = vadd.f32 %v3447_v22, %v3273_v53  ;;  %v3460_v25 = vsel %vm136_vm0, %v3456_v21, 0.0 }
0x1d8d   :  { %3461 = vadd.xlane.f32.xlu0 %v3460_v25 }
0x1d8e   :  { %v3457_v27 = vsel %vm136_vm0, %v3455_v24, 0.0 }
0x1d8f   :  { %3458 = vadd.xlane.f32.xlu1 %v3457_v27 }
0x1e16   :  { %v3462_v26 = vpop.xlane.xlu0 %3461 }
0x1e17   :  { %v3464_v29 = vmul.f32 0.03125, %v3462_v26 }
0x1e18   :  { %v3459_v30 = vpop.xlane.xlu1 %3458 }
0x1e19   :  { %v3466_v31 = vsub.f32 %v3456_v21, %v3464_v29  ;;  %v3463_v32 = vmul.f32 0.03125, %v3459_v30 }
0x1e1b   :  { %v3465_v33 = vsub.f32 %v3455_v24, %v3463_v32  ;;  %v3468_v34 = vmul.f32 %v3466_v31, %v3466_v31 }
0x1e1d   :  { %v3472_v35 = vsel %vm136_vm0, %v3468_v34, 0.0  ;;  %v3467_v36 = vmul.f32 %v3465_v33, %v3465_v33 }
0x1e1e   :  { %3473 = vadd.xlane.f32.xlu0 %v3472_v35 }
0x1e1f   :  { %v3469_v38 = vsel %vm136_vm0, %v3467_v36, 0.0 }
0x1e20   :  { %3470 = vadd.xlane.f32.xlu1 %v3469_v38 }
0x1ea7   :  { %v3474_v40 = vpop.xlane.xlu0 %3473 }
0x1ea8   :  { %v3476_v42 = vmul.f32 0.03125, %v3474_v40 }
0x1ea9   :  { %v3471_v44 = vpop.xlane.xlu1 %3470 }
0x1eaa   :  { %v3478_v45 = vadd.f32 1e-05, %v3476_v42  ;;  %v3475_v46 = vmul.f32 0.03125, %v3471_v44 }
0x1eac   :  { %3968 = vrsqrt.f32 %v3478_v45  ;;  %v3477_v12 = vadd.f32 1e-05, %v3475_v46 }
0x1eae   :  { %3970 = vrsqrt.f32 %v3477_v12 }
0x1eb9   :  { %v3969_v51 = vpop.eup %3968 }
0x1eba   :  { %v3482_v54 = vmul.f32 %v3969_v51, %v3466_v31 }
0x1ebb   :  { %v3971_v55 = vpop.eup %3970 }
0x1ebc   :  { %v3481_v58 = vmul.f32 %v3971_v55, %v3465_v33  ;;  %v3488_v60 = vmul.f32 %v3486_v50, %v3482_v54 }
0x1ebe   :  { %v3487_v61 = vmul.f32 %v3486_v50, %v3481_v58  ;;  %v3494_v62 = vadd.f32 %v3573_v56, %v3488_v60 }
0x1ec0   :  { %v3493_v63 = vadd.f32 %v3573_v56, %v3487_v61  ;;  %3496 = vst.msk [vmem:[#allocation15 + $0x8] sm:$0xff] %vm136_vm0, %v3494_v62 }
0x1ec2   :  { %3495 = vst.msk [vmem:[#allocation15] sm:$0xff] %vm136_vm0, %v3493_v63 }
0x1ec3   :  { %4126 = shalt.err (!%p4123_p11)
}
0x1ec4   :  { %3508 = dma.vmem_to_hbm [thread:$0]  %s3503_s8, 256, %s4617_s7, [#allocation5], %s4147_s29, %s4147_s29, %s4148_s30  }
0x1ec5   :  { %4143 = dma.done.wait [#allocation5], 256  }
0x1ec6   :  { %4144 = vsyncadd [#allocation5], 4294967040 }
0x1ec7   :  { %3512 = vsyncpa [#allocation4], 1 }
0x1ec8   :  { %3513 = vsyncpa [#allocation7], 1 }
0x1ec9   :  { %3514 = vsyncpa [#allocation10], 1 }
0x1eca   :  { %3515 = vsyncpa [#allocation13], 1 }
0x1ecb   :  { %3516 = vsyncpa [#allocation5], 1 }

</bundles_post_ra>
